<compile_context>
chip_gen: v7x
topology: tpu7x:2x2x1
jax: 0.10.0
libtpu: 0.0.40
codegen_flags: <defaults>
</compile_context>

<pallas_src>
import numpy as np
import jax
import jax.numpy as jnp
from jax.experimental import pallas as pl
from jax.experimental.pallas import tpu as pltpu


def _encoder_img_kernel(x_ref, gamma_ref, beta_ref, w_ref, b_ref, o_ref):
    # x_ref:      (K, ts)  f32 channels-major activation tile (batch dim squeezed)
    # gamma/beta: (1, K)   f32 LayerNorm affine params (resident)
    # w_ref:      (K, N)   bf16 Linear weight (resident)
    # b_ref:      (1, N)   f32 Linear bias (resident)
    # o_ref:      (ts, N)  f32 output tile
    x = jnp.transpose(x_ref[...], (1, 0))          # (ts, K): in-VMEM XLU transpose, K lane-dense

    # One-pass LayerNorm statistics (biased variance, matches torch.nn.LayerNorm).
    mean = jnp.mean(x, axis=-1, keepdims=True)
    mean_sq = jnp.mean(x * x, axis=-1, keepdims=True)
    var = jnp.maximum(mean_sq - mean * mean, 0.0)
    inv = jax.lax.rsqrt(var + 1e-6)                # eps matches nn.LayerNorm(eps=1e-06)

    h = (x - mean) * inv * gamma_ref[...] + beta_ref[...]
    h = jnp.maximum(h, 0.0)                        # ReLU

    acc = jnp.dot(h.astype(jnp.bfloat16), w_ref[...],
                  preferred_element_type=jnp.float32)
    o_ref[...] = (acc + b_ref[...]).astype(o_ref.dtype)


def _pick_s_tile(s: int) -> int:
    # The spatial tile is the lane dim of the (K, ts) channels-major input block:
    # legal sizes are multiples of 128, or the full spatial extent S.  Cap at 512
    # so the double-buffered f32 activation tile stays ~4 MiB (fits v7x's 64 MiB
    # VMEM with headroom) and the grid keeps multiple steps at realistic sizes.
    if s <= 512 and s % 128 != 0:
        return s                                   # one full-extent spatial block per image
    return max(128, min(512, s - s % 128))         # lane-aligned; cdiv handles the tail


def encoder_img_forward(feat: jnp.ndarray,
                        gamma: jnp.ndarray,
                        beta: jnp.ndarray,
                        w_t: jnp.ndarray,
                        bias: jnp.ndarray) -> jnp.ndarray:
    """feat: (B, C=2048, H, W) resnet-trunk output; gamma/beta: (C,);
    w_t: (C, d_model) (already-transposed Linear weight); bias: (d_model,).
    Returns (B, H*W, d_model)."""
    B, C, H, W = feat.shape
    S = H * W
    K, N = C, w_t.shape[1]

    x3d = feat.reshape(B, C, S)                    # free metadata reshape; transpose happens in-kernel
    ts = _pick_s_tile(S)
    grid = (B, pl.cdiv(S, ts))

    out = pl.pallas_call(
        _encoder_img_kernel,
        out_shape=jax.ShapeDtypeStruct((B, S, N), feat.dtype),
        grid_spec=pltpu.PrefetchScalarGridSpec(
            num_scalar_prefetch=0,
            grid=grid,
            in_specs=[
                pl.BlockSpec((None, K, ts), lambda b, s: (b, 0, s)),  # channels-major slab
                pl.BlockSpec((1, K), lambda b, s: (0, 0)),            # LN gamma (resident)
                pl.BlockSpec((1, K), lambda b, s: (0, 0)),            # LN beta  (resident)
                pl.BlockSpec((K, N), lambda b, s: (0, 0)),            # bf16 weight (resident)
                pl.BlockSpec((1, N), lambda b, s: (0, 0)),            # bias (resident)
            ],
            out_specs=pl.BlockSpec((None, ts, N), lambda b, s: (b, s, 0)),
        ),
        compiler_params=pltpu.CompilerParams(
            dimension_semantics=("parallel", "parallel"),
            vmem_limit_bytes=32 * 1024 * 1024,
        ),
    )(x3d, gamma.reshape(1, K), beta.reshape(1, K),
      w_t.astype(jnp.bfloat16), bias.reshape(1, N))

    return out


if __name__ == "__main__":
    flatten_dim = 2048        # resnet50 trunk channels (fixed by the module)
    d_model = 256             # lane-dense (multiple of 128) output width
    B, Hs, Ws = 2, 4, 4       # small spatial map (resnet50 trunk on a 128x128 image)

    key = jax.random.PRNGKey(0)
    k_feat, k_g, k_b, k_w, k_bias = jax.random.split(key, 5)

    feat = jax.random.normal(k_feat, (B, flatten_dim, Hs, Ws), dtype=jnp.float32)
    gamma = 1.0 + 0.1 * jax.random.normal(k_g, (flatten_dim,), dtype=jnp.float32)
    beta = 0.1 * jax.random.normal(k_b, (flatten_dim,), dtype=jnp.float32)
    w_t = jax.random.normal(k_w, (flatten_dim, d_model), dtype=jnp.float32) / np.sqrt(flatten_dim)
    bias = 0.1 * jax.random.normal(k_bias, (d_model,), dtype=jnp.float32)

    out = encoder_img_forward(feat, gamma, beta, w_t, bias)
    out = jax.block_until_ready(out)

    # Pure-JAX f32 reference of the same post-resnet forward for a sanity check.
    S = Hs * Ws
    x = jnp.transpose(feat.reshape(B, flatten_dim, S), (0, 2, 1))
    mean = jnp.mean(x, axis=-1, keepdims=True)
    var = jnp.mean((x - mean) ** 2, axis=-1, keepdims=True)
    h = (x - mean) * jax.lax.rsqrt(var + 1e-6) * gamma + beta
    h = jnp.maximum(h, 0.0)
    ref = jnp.dot(h, w_t) + bias

    # bf16 matmul operands (weight + activations) introduce ~1e-2-scale error over the
    # K=2048 contraction; LayerNorm stats and MXU accumulation remain f32.
    np.testing.assert_allclose(np.asarray(out), np.asarray(ref), rtol=3e-2, atol=3e-2)
    print("KERNEL_OK")
</pallas_src>

<mosaic_0001>
module attributes {stable_mosaic.version = 11 : i64} {
  func.func @_encoder_img_kernel(%arg0: i32, %arg1: i32, %arg2: memref<1x2048x16xf32, #tpu.memory_space<vmem>>, %arg3: memref<1x2048xf32, #tpu.memory_space<vmem>>, %arg4: memref<1x2048xf32, #tpu.memory_space<vmem>>, %arg5: memref<2048x256xbf16, #tpu.memory_space<vmem>>, %arg6: memref<1x256xf32, #tpu.memory_space<vmem>>, %arg7: memref<1x16x256xf32, #tpu.memory_space<vmem>>) attributes {dimension_semantics = [#tpu.dimension_semantics<parallel>, #tpu.dimension_semantics<parallel>], iteration_bounds = array<i64: 2, 1>, scalar_prefetch = 0 : i64, scratch_operands = 0 : i64, tpu.core_type = #tpu.core_type<tc>, window_params = [{transform_indices = @transform_0, window_bounds = array<i64: 1, 2048, 16>}, {pipeline_mode = #tpu.pipeline_mode<synchronous>, transform_indices = @transform_1, window_bounds = array<i64: 1, 2048>}, {pipeline_mode = #tpu.pipeline_mode<synchronous>, transform_indices = @transform_2, window_bounds = array<i64: 1, 2048>}, {pipeline_mode = #tpu.pipeline_mode<synchronous>, transform_indices = @transform_3, window_bounds = array<i64: 2048, 256>}, {pipeline_mode = #tpu.pipeline_mode<synchronous>, transform_indices = @transform_4, window_bounds = array<i64: 1, 256>}, {transform_indices = @transform_5, window_bounds = array<i64: 1, 16, 256>}]} {
    %c0 = arith.constant 0 : index
    %c0_0 = arith.constant 0 : index
    %c0_1 = arith.constant 0 : index
    %0 = vector.load %arg2[%c0, %c0_0, %c0_1] : memref<1x2048x16xf32, #tpu.memory_space<vmem>>, vector<1x2048x16xf32>
    %1 = vector.shape_cast %0 : vector<1x2048x16xf32> to vector<2048x16xf32>
    %2 = tpu.transpose %1, [1, 0] : vector<2048x16xf32> -> vector<16x2048xf32>
    %cst = arith.constant dense<0.000000e+00> : vector<16xf32>
    %3 = vector.multi_reduction <add>, %2, %cst [1] : vector<16x2048xf32> to vector<16xf32>
    %4 = vector.shape_cast %3 : vector<16xf32> to vector<16x1xf32>
    %cst_2 = arith.constant 2.048000e+03 : f32
    %5 = vector.broadcast %cst_2 : f32 to vector<16x1xf32>
    %6 = arith.divf %4, %5 : vector<16x1xf32>
    %7 = arith.mulf %2, %2 : vector<16x2048xf32>
    %cst_3 = arith.constant dense<0.000000e+00> : vector<16xf32>
    %8 = vector.multi_reduction <add>, %7, %cst_3 [1] : vector<16x2048xf32> to vector<16xf32>
    %9 = vector.shape_cast %8 : vector<16xf32> to vector<16x1xf32>
    %cst_4 = arith.constant 2.048000e+03 : f32
    %10 = vector.broadcast %cst_4 : f32 to vector<16x1xf32>
    %11 = arith.divf %9, %10 : vector<16x1xf32>
    %12 = arith.mulf %6, %6 : vector<16x1xf32>
    %13 = arith.subf %11, %12 : vector<16x1xf32>
    %cst_5 = arith.constant 0.000000e+00 : f32
    %14 = vector.broadcast %cst_5 : f32 to vector<16x1xf32>
    %15 = arith.maximumf %13, %14 : vector<16x1xf32>
    %cst_6 = arith.constant 9.99999997E-7 : f32
    %16 = vector.broadcast %cst_6 : f32 to vector<16x1xf32>
    %17 = arith.addf %15, %16 : vector<16x1xf32>
    %18 = math.rsqrt %17 : vector<16x1xf32>
    %19 = vector.broadcast %6 : vector<16x1xf32> to vector<16x2048xf32>
    %20 = arith.subf %2, %19 : vector<16x2048xf32>
    %21 = vector.broadcast %18 : vector<16x1xf32> to vector<16x2048xf32>
    %22 = arith.mulf %20, %21 : vector<16x2048xf32>
    %c0_7 = arith.constant 0 : index
    %c0_8 = arith.constant 0 : index
    %23 = vector.load %arg3[%c0_7, %c0_8] : memref<1x2048xf32, #tpu.memory_space<vmem>>, vector<1x2048xf32>
    %24 = vector.broadcast %23 : vector<1x2048xf32> to vector<16x2048xf32>
    %25 = arith.mulf %22, %24 : vector<16x2048xf32>
    %c0_9 = arith.constant 0 : index
    %c0_10 = arith.constant 0 : index
    %26 = vector.load %arg4[%c0_9, %c0_10] : memref<1x2048xf32, #tpu.memory_space<vmem>>, vector<1x2048xf32>
    %27 = vector.broadcast %26 : vector<1x2048xf32> to vector<16x2048xf32>
    %28 = arith.addf %25, %27 : vector<16x2048xf32>
    %cst_11 = arith.constant 0.000000e+00 : f32
    %29 = vector.broadcast %cst_11 : f32 to vector<16x2048xf32>
    %30 = arith.maximumf %28, %29 : vector<16x2048xf32>
    %31 = arith.truncf %30 : vector<16x2048xf32> to vector<16x2048xbf16>
    %c0_12 = arith.constant 0 : index
    %c0_13 = arith.constant 0 : index
    %32 = vector.load %arg5[%c0_12, %c0_13] : memref<2048x256xbf16, #tpu.memory_space<vmem>>, vector<2048x256xbf16>
    %cst_14 = arith.constant dense<0.000000e+00> : vector<16x256xf32>
    %33 = tpu.matmul %31, %32, %cst_14 {dimension_numbers = #tpu.dot_dimension_numbers<[1], [0], [0], [1], [0, 0, 1, 1], [], []>} : vector<16x2048xbf16>, vector<2048x256xbf16>, vector<16x256xf32> -> vector<16x256xf32>
    %c0_15 = arith.constant 0 : index
    %c0_16 = arith.constant 0 : index
    %34 = vector.load %arg6[%c0_15, %c0_16] : memref<1x256xf32, #tpu.memory_space<vmem>>, vector<1x256xf32>
    %35 = vector.broadcast %34 : vector<1x256xf32> to vector<16x256xf32>
    %36 = arith.addf %33, %35 : vector<16x256xf32>
    %c0_17 = arith.constant 0 : index
    %c0_18 = arith.constant 0 : index
    %c0_19 = arith.constant 0 : index
    %37 = vector.load %arg7[%c0_17, %c0_18, %c0_19] : memref<1x16x256xf32, #tpu.memory_space<vmem>>, vector<1x16x256xf32>
    %38 = vector.shape_cast %37 : vector<1x16x256xf32> to vector<16x256xf32>
    %39 = vector.shape_cast %36 : vector<16x256xf32> to vector<1x16x256xf32>
    tpu.vector_store %arg7[%c0_17, %c0_18, %c0_19], %39 {strides = array<i32>} : memref<1x16x256xf32, #tpu.memory_space<vmem>>, vector<1x16x256xf32>,
    return
  }
  func.func @transform_0(%arg0: i32, %arg1: i32) -> (i32, i32, i32) {
    %c0_i32 = arith.constant 0 : i32
    %c0_i32_0 = arith.constant 0 : i32
    return %arg0, %c0_i32, %arg1 : i32, i32, i32
  }
  func.func @transform_1(%arg0: i32, %arg1: i32) -> (i32, i32) {
    %c0_i32 = arith.constant 0 : i32
    %c0_i32_0 = arith.constant 0 : i32
    %c0_i32_1 = arith.constant 0 : i32
    return %c0_i32, %c0_i32_0 : i32, i32
  }
  func.func @transform_2(%arg0: i32, %arg1: i32) -> (i32, i32) {
    %c0_i32 = arith.constant 0 : i32
    %c0_i32_0 = arith.constant 0 : i32
    %c0_i32_1 = arith.constant 0 : i32
    return %c0_i32, %c0_i32_0 : i32, i32
  }
  func.func @transform_3(%arg0: i32, %arg1: i32) -> (i32, i32) {
    %c0_i32 = arith.constant 0 : i32
    %c0_i32_0 = arith.constant 0 : i32
    %c0_i32_1 = arith.constant 0 : i32
    return %c0_i32, %c0_i32_0 : i32, i32
  }
  func.func @transform_4(%arg0: i32, %arg1: i32) -> (i32, i32) {
    %c0_i32 = arith.constant 0 : i32
    %c0_i32_0 = arith.constant 0 : i32
    %c0_i32_1 = arith.constant 0 : i32
    return %c0_i32, %c0_i32_0 : i32, i32
  }
  func.func @transform_5(%arg0: i32, %arg1: i32) -> (i32, i32, i32) {
    %c0_i32 = arith.constant 0 : i32
    %c0_i32_0 = arith.constant 0 : i32
    return %arg0, %arg1, %c0_i32 : i32, i32, i32
  }
}

</mosaic_0001>

<bundles_post_ra>
// kernel: tpu_custom_call.1
= control target key start
LH: loop header
LB: loop body
LE: loop exit
PB: predicated region body
PF: predicated region fallthrough
CT: control target
= control target key end

     0   :  { %10 = vsyncpa [#allocation3], 0  ;;  %s6019_s0 = inlined_call_operand.vmem [shape: f32[2,2048,16], index: 0, kind: input, shape index: {}]   ;;  %s6020_s1 = inlined_call_operand.vmem [shape: f32[1,2048], index: 1, kind: input, shape index: {}]   ;;  %s6021_s2 = inlined_call_operand.vmem [shape: f32[1,2048], index: 2, kind: input, shape index: {}]   ;;  %s6022_s3 = inlined_call_operand.vmem [shape: bf16[2048,256], index: 3, kind: input, shape index: {}]   ;;  %s6023_s4 = inlined_call_operand.vmem [shape: f32[1,256], index: 4, kind: input, shape index: {}]   ;;  %s6024_s5 = inlined_call_operand.hbm [shape: f32[2,16,256], index: 5, kind: output, shape index: {}]  }
   0x1   :  { %12 = vsyncpa [#allocation3 + $0x1], 0  ;;  %s4329_s18 = smov 0   ;;  %s4331_s19 = smov 0  }
   0x2   :  { %s4333_s20 = smov 0   ;;  %s4335_s21 = smov 0  }
   0x3   :  { %s4337_s22 = smov 0   ;;  %s4339_s23 = smov 0  }
   0x4 LB: > { %s3468_s24 = sadd.s32 4294967295, %s4294_s23   ;;  %s3469_s25 = sadd.s32 4294967294, %s4294_s23   ;;  %s4294_s23 = sphi %s4339_s23, %s18_s23   ;;  %s4290_s22 = sphi %s4337_s22, %s6103_s22   ;;  %s4286_s21 = sphi %s4335_s21, %s6102_s21   ;;  %s4282_s20 = sphi %s4333_s20, %s6101_s20   ;;  %s4278_s19 = sphi %s4331_s19, %s6100_s19   ;;  %s4274_s18 = sphi %s4329_s18, %s6099_s18  }
   0x5   : > { %s30_s26 = sadd.s32 1, %s4290_s22  ;;  %s151_s27 = sadd.s32 1, %s4282_s20 }
   0x6   : > { %p32_p0 = scmp.ge.s32.totalorder %s30_s26, 2  ;;  %p161_p1 = scmp.ne.s32.totalorder %s4282_s20, %s4278_s19 }
   0x7   : > { %p162_p2 = scmp.eq.s32.totalorder %s3468_s24, 1  ;;  %p167_p3 = scmp.ne.s32.totalorder %s4278_s19, %s4274_s18 }
   0x8   : > { %s6105_s26 = smov (%p32_p0, %s30_s26), 0  ;;  %p168_p5 = scmp.eq.s32.totalorder %s3469_s25, 1 }
   0x9   : > { %p4369_p4 = por %p162_p2, %p161_p1  ;;  %s146_s29 = ssub.s32 %s4290_s22, %s6105_s26 }
   0xa   : > { %p3472_p6 = scmp.ge.s32.totalorder %s4294_s23, 1  ;;  %p149_p7 = scmp.eq.s32.totalorder %s146_s29, 0 }
   0xb   : > { %p4376_p8 = por %p168_p5, %p167_p3  ;;  %p209_p9 = scmp.lt.s32.totalorder %s4294_s23, 3 }
   0xc   : > { %s4382_s6 = scalar_select %p149_p7, %s4282_s20, %s151_s27  }
   0xd   : > { %p210_p10 = pnand %p3472_p6, %p209_p9 }
   0xf   : > { %213 = sbr.rel (%p210_p10) target bundleno = 1220 (0x4c4), region = 40 }
  0x16   : > { %p240_p11 = scmp.lt.s32.totalorder %s4286_s21, 1  ;;  %s237_s12 = sand.u32 1, %s4278_s19  }
  0x17   : > { %s3473_s13 = sshll.u32 %s237_s12, 5  ;;  %s3738_s16 = sshll.u32 %s4286_s21, 9 }
  0x18   : > { %s241_s7 = scalar_select %p240_p11, %s4286_s21, 1 }
  0x19   : > { %s239_s14 = scalar_lea.vmem [#allocation2], %s3473_s13  ;;  %s5971_s24 = scalar_lea.hbm %s6024_s5, %s3738_s16 }
  0x1a   : > { %s3737_s8 = sshll.u32 %s241_s7, 11  ;;  %s3389_s15 = sshll.u32 %s239_s14, 4  ;;  %s5966_s15 = int_to_ptr.vmem [resolvable:$true] %s3389_s15 }
  0x1b   : > { %s4389_s11 = scalar_lea.vmem %s6019_s0, %s3737_s8  ;;  %s5973_s21 = scalar_lea.sflag [#allocation3], %s237_s12 }
  0x1c   : > { %v249_v0 = vld [vmem:[%s4389_s11] sm:$0xff]  ;;  %v250_v2 = vld [vmem:[%s4389_s11 + $0x8] sm:$0xff]  ;;  %v251_v4 = vld [vmem:[%s4389_s11 + $0x10] sm:$0xff]  ;;  %s4216_s25 = scalar_lea.vmem %s5966_s15, 512  ;;  %s4296_s27 = smov [#allocation2]  }
  0x1d   : > { %v265_v1 = vld [vmem:[%s4389_s11 + $0x80] sm:$0xff]  ;;  %505 = vxpose.xlu0.b32.start [1/16] (narrow) %v249_v0, 16  ;;  %v266_v3 = vld [vmem:[%s4389_s11 + $0x88] sm:$0xff]  ;;  %v267_v5 = vld [vmem:[%s4389_s11 + $0x90] sm:$0xff]  ;;  %p4217_p12 = scmp.ne.s32.totalorder %s5966_s15, %s4216_s25  ;;  %s4220_s29 = sshll.u32 %s4296_s27, 4  ;;  %s4221_s29 = int_to_ptr.vmem [resolvable:$false] %s4220_s29 }
  0x1e   : > { %537 = vxpose.xlu1.b32.start [1/16] (narrow) %v265_v1, 16  ;;  %v252_v6 = vld [vmem:[%s4389_s11 + $0x18] sm:$0xff]  ;;  %v253_v8 = vld [vmem:[%s4389_s11 + $0x20] sm:$0xff]  ;;  %v254_v10 = vld [vmem:[%s4389_s11 + $0x28] sm:$0xff]  ;;  %s4222_s7 = scalar_lea.vmem %s4221_s29, 1024  ;;  %p4223_p1 = scmp.lt.s32.totalorder %s5966_s15, %s4221_s29 }
  0x1f   : > { %v268_v7 = vld [vmem:[%s4389_s11 + $0x98] sm:$0xff]  ;;  %v269_v9 = vld [vmem:[%s4389_s11 + $0xa0] sm:$0xff]  ;;  %v270_v11 = vld [vmem:[%s4389_s11 + $0xa8] sm:$0xff]  ;;  %p4218_p13 = pnand %p4217_p12, %p4369_p4  ;;  %p4224_p2 = scmp.lt.s32.totalorder %s4222_s7, %s4216_s25 }
  0x20   : > { %v255_v12 = vld [vmem:[%s4389_s11 + $0x30] sm:$0xff]  ;;  %v256_v14 = vld [vmem:[%s4389_s11 + $0x38] sm:$0xff]  ;;  %v257_v16 = vld [vmem:[%s4389_s11 + $0x40] sm:$0xff] }
  0x21   : > { %506 = vxpose.xlu0.b32.cont [2/16] (narrow) %v250_v2, 16  ;;  %v271_v13 = vld [vmem:[%s4389_s11 + $0xb0] sm:$0xff]  ;;  %v272_v15 = vld [vmem:[%s4389_s11 + $0xb8] sm:$0xff]  ;;  %v273_v17 = vld [vmem:[%s4389_s11 + $0xc0] sm:$0xff]  ;;  %p4219_p0 = pneg %p4218_p13  ;;  %p4225_p3 = por %p4224_p2, %p4223_p1 }
  0x22   : > { %538 = vxpose.xlu1.b32.cont [2/16] (narrow) %v266_v3, 16  ;;  %v258_v18 = vld [vmem:[%s4389_s11 + $0x48] sm:$0xff]  ;;  %v259_v20 = vld [vmem:[%s4389_s11 + $0x50] sm:$0xff]  ;;  %v260_v22 = vld [vmem:[%s4389_s11 + $0x58] sm:$0xff] }
  0x23   : > { %v274_v19 = vld [vmem:[%s4389_s11 + $0xc8] sm:$0xff]  ;;  %v275_v21 = vld [vmem:[%s4389_s11 + $0xd0] sm:$0xff]  ;;  %v276_v23 = vld [vmem:[%s4389_s11 + $0xd8] sm:$0xff]  ;;  %p4226_p5 = pnand %p4225_p3, %p4219_p0 }
  0x24   : > { %v261_v24 = vld [vmem:[%s4389_s11 + $0x60] sm:$0xff]  ;;  %v262_v26 = vld [vmem:[%s4389_s11 + $0x68] sm:$0xff]  ;;  %v263_v28 = vld [vmem:[%s4389_s11 + $0x70] sm:$0xff] }
  0x25   : > { %507 = vxpose.xlu0.b32.cont [3/16] (narrow) %v251_v4, 16  ;;  %v277_v25 = vld [vmem:[%s4389_s11 + $0xe0] sm:$0xff]  ;;  %v278_v27 = vld [vmem:[%s4389_s11 + $0xe8] sm:$0xff]  ;;  %v279_v29 = vld [vmem:[%s4389_s11 + $0xf0] sm:$0xff] }
  0x26   : > { %539 = vxpose.xlu1.b32.cont [3/16] (narrow) %v267_v5, 16  ;;  %v264_v30 = vld [vmem:[%s4389_s11 + $0x78] sm:$0xff]  ;;  %v281_v32 = vld [vmem:[%s4389_s11 + $0x100] sm:$0xff]  ;;  %v282_v34 = vld [vmem:[%s4389_s11 + $0x108] sm:$0xff] }
  0x27   : > { %v280_v31 = vld [vmem:[%s4389_s11 + $0xf8] sm:$0xff]  ;;  %v297_v33 = vld [vmem:[%s4389_s11 + $0x180] sm:$0xff]  ;;  %v298_v35 = vld [vmem:[%s4389_s11 + $0x188] sm:$0xff] }
  0x28   : > { %v283_v36 = vld [vmem:[%s4389_s11 + $0x110] sm:$0xff]  ;;  %v284_v38 = vld [vmem:[%s4389_s11 + $0x118] sm:$0xff]  ;;  %v285_v40 = vld [vmem:[%s4389_s11 + $0x120] sm:$0xff] }
  0x29   : > { %508 = vxpose.xlu0.b32.cont [4/16] (narrow) %v252_v6, 16  ;;  %v299_v37 = vld [vmem:[%s4389_s11 + $0x190] sm:$0xff]  ;;  %v300_v39 = vld [vmem:[%s4389_s11 + $0x198] sm:$0xff]  ;;  %v301_v41 = vld [vmem:[%s4389_s11 + $0x1a0] sm:$0xff] }
  0x2a   : > { %540 = vxpose.xlu1.b32.cont [4/16] (narrow) %v268_v7, 16  ;;  %v286_v42 = vld [vmem:[%s4389_s11 + $0x128] sm:$0xff]  ;;  %v287_v44 = vld [vmem:[%s4389_s11 + $0x130] sm:$0xff]  ;;  %v288_v46 = vld [vmem:[%s4389_s11 + $0x138] sm:$0xff] }
  0x2b   : > { %v302_v43 = vld [vmem:[%s4389_s11 + $0x1a8] sm:$0xff]  ;;  %v303_v45 = vld [vmem:[%s4389_s11 + $0x1b0] sm:$0xff]  ;;  %v304_v47 = vld [vmem:[%s4389_s11 + $0x1b8] sm:$0xff] }
  0x2c   : > { %v289_v48 = vld [vmem:[%s4389_s11 + $0x140] sm:$0xff]  ;;  %v290_v50 = vld [vmem:[%s4389_s11 + $0x148] sm:$0xff]  ;;  %v291_v52 = vld [vmem:[%s4389_s11 + $0x150] sm:$0xff] }
  0x2d   : > { %509 = vxpose.xlu0.b32.cont [5/16] (narrow) %v253_v8, 16  ;;  %v305_v49 = vld [vmem:[%s4389_s11 + $0x1c0] sm:$0xff]  ;;  %v306_v51 = vld [vmem:[%s4389_s11 + $0x1c8] sm:$0xff]  ;;  %v307_v53 = vld [vmem:[%s4389_s11 + $0x1d0] sm:$0xff] }
  0x2e   : > { %541 = vxpose.xlu1.b32.cont [5/16] (narrow) %v269_v9, 16  ;;  %v292_v54 = vld [vmem:[%s4389_s11 + $0x158] sm:$0xff]  ;;  %v293_v56 = vld [vmem:[%s4389_s11 + $0x160] sm:$0xff]  ;;  %v294_v58 = vld [vmem:[%s4389_s11 + $0x168] sm:$0xff] }
  0x2f   : > { %v308_v55 = vld [vmem:[%s4389_s11 + $0x1d8] sm:$0xff]  ;;  %v309_v57 = vld [vmem:[%s4389_s11 + $0x1e0] sm:$0xff]  ;;  %v310_v59 = vld [vmem:[%s4389_s11 + $0x1e8] sm:$0xff] }
  0x30   : > { %v295_v60 = vld [vmem:[%s4389_s11 + $0x170] sm:$0xff]  ;;  %v296_v62 = vld [vmem:[%s4389_s11 + $0x178] sm:$0xff]  ;;  %v313_v0 = vld [vmem:[%s4389_s11 + $0x200] sm:$0xff] }
  0x31   : > { %510 = vxpose.xlu0.b32.cont [6/16] (narrow) %v254_v10, 16  ;;  %v311_v61 = vld [vmem:[%s4389_s11 + $0x1f0] sm:$0xff]  ;;  %v312_v63 = vld [vmem:[%s4389_s11 + $0x1f8] sm:$0xff]  ;;  %v329_v1 = vld [vmem:[%s4389_s11 + $0x280] sm:$0xff] }
  0x32   : > { %542 = vxpose.xlu1.b32.cont [6/16] (narrow) %v270_v11, 16  ;;  %v314_v2 = vld [vmem:[%s4389_s11 + $0x208] sm:$0xff]  ;;  %v315_v4 = vld [vmem:[%s4389_s11 + $0x210] sm:$0xff]  ;;  %v316_v6 = vld [vmem:[%s4389_s11 + $0x218] sm:$0xff] }
  0x33   : > { %v330_v3 = vld [vmem:[%s4389_s11 + $0x288] sm:$0xff]  ;;  %v331_v5 = vld [vmem:[%s4389_s11 + $0x290] sm:$0xff]  ;;  %v332_v7 = vld [vmem:[%s4389_s11 + $0x298] sm:$0xff] }
  0x34   : > { %v317_v8 = vld [vmem:[%s4389_s11 + $0x220] sm:$0xff]  ;;  %v318_v10 = vld [vmem:[%s4389_s11 + $0x228] sm:$0xff] }
  0x35   : > { %511 = vxpose.xlu0.b32.cont [7/16] (narrow) %v255_v12, 16  ;;  %v333_v9 = vld [vmem:[%s4389_s11 + $0x2a0] sm:$0xff]  ;;  %v334_v11 = vld [vmem:[%s4389_s11 + $0x2a8] sm:$0xff]  ;;  %v319_v12 = vld [vmem:[%s4389_s11 + $0x230] sm:$0xff] }
  0x36   : > { %543 = vxpose.xlu1.b32.cont [7/16] (narrow) %v271_v13, 16  ;;  %v335_v13 = vld [vmem:[%s4389_s11 + $0x2b0] sm:$0xff] }
  0x39   : > { %512 = vxpose.xlu0.b32.cont [8/16] (narrow) %v256_v14, 16  ;;  %v320_v14 = vld [vmem:[%s4389_s11 + $0x238] sm:$0xff] }
  0x3a   : > { %544 = vxpose.xlu1.b32.cont [8/16] (narrow) %v272_v15, 16  ;;  %v336_v15 = vld [vmem:[%s4389_s11 + $0x2b8] sm:$0xff] }
  0x3d   : > { %513 = vxpose.xlu0.b32.cont [9/16] (narrow) %v257_v16, 16  ;;  %v321_v16 = vld [vmem:[%s4389_s11 + $0x240] sm:$0xff] }
  0x3e   : > { %545 = vxpose.xlu1.b32.cont [9/16] (narrow) %v273_v17, 16  ;;  %v337_v17 = vld [vmem:[%s4389_s11 + $0x2c0] sm:$0xff] }
  0x41   : > { %514 = vxpose.xlu0.b32.cont [10/16] (narrow) %v258_v18, 16  ;;  %v322_v18 = vld [vmem:[%s4389_s11 + $0x248] sm:$0xff] }
  0x42   : > { %546 = vxpose.xlu1.b32.cont [10/16] (narrow) %v274_v19, 16  ;;  %v338_v19 = vld [vmem:[%s4389_s11 + $0x2c8] sm:$0xff] }
  0x45   : > { %515 = vxpose.xlu0.b32.cont [11/16] (narrow) %v259_v20, 16  ;;  %v323_v20 = vld [vmem:[%s4389_s11 + $0x250] sm:$0xff] }
  0x46   : > { %547 = vxpose.xlu1.b32.cont [11/16] (narrow) %v275_v21, 16  ;;  %v339_v21 = vld [vmem:[%s4389_s11 + $0x2d0] sm:$0xff] }
  0x49   : > { %516 = vxpose.xlu0.b32.cont [12/16] (narrow) %v260_v22, 16  ;;  %v324_v22 = vld [vmem:[%s4389_s11 + $0x258] sm:$0xff] }
  0x4a   : > { %548 = vxpose.xlu1.b32.cont [12/16] (narrow) %v276_v23, 16  ;;  %v340_v23 = vld [vmem:[%s4389_s11 + $0x2d8] sm:$0xff] }
  0x4d   : > { %517 = vxpose.xlu0.b32.cont [13/16] (narrow) %v261_v24, 16  ;;  %v325_v24 = vld [vmem:[%s4389_s11 + $0x260] sm:$0xff] }
  0x4e   : > { %549 = vxpose.xlu1.b32.cont [13/16] (narrow) %v277_v25, 16  ;;  %v341_v25 = vld [vmem:[%s4389_s11 + $0x2e0] sm:$0xff] }
  0x51   : > { %518 = vxpose.xlu0.b32.cont [14/16] (narrow) %v262_v26, 16  ;;  %v326_v26 = vld [vmem:[%s4389_s11 + $0x268] sm:$0xff] }
  0x52   : > { %550 = vxpose.xlu1.b32.cont [14/16] (narrow) %v278_v27, 16  ;;  %v342_v27 = vld [vmem:[%s4389_s11 + $0x2e8] sm:$0xff] }
  0x55   : > { %519 = vxpose.xlu0.b32.cont [15/16] (narrow) %v263_v28, 16  ;;  %v327_v28 = vld [vmem:[%s4389_s11 + $0x270] sm:$0xff] }
  0x56   : > { %551 = vxpose.xlu1.b32.cont [15/16] (narrow) %v279_v29, 16  ;;  %v343_v29 = vld [vmem:[%s4389_s11 + $0x2f0] sm:$0xff] }
  0x59   : > { %520 = vxpose.xlu0.b32.end [16/16] (narrow) %v264_v30, 16  ;;  %v328_v30 = vld [vmem:[%s4389_s11 + $0x278] sm:$0xff] }
  0x5a   : > { %552 = vxpose.xlu1.b32.end [16/16] (narrow) %v280_v31, 16  ;;  %v344_v31 = vld [vmem:[%s4389_s11 + $0x2f8] sm:$0xff] }
  0x5d   : > { %569 = vxpose.xlu0.b32.start [1/16] (narrow) %v281_v32, 16  ;;  %v345_v32 = vld [vmem:[%s4389_s11 + $0x300] sm:$0xff] }
  0x5e   : > { %601 = vxpose.xlu1.b32.start [1/16] (narrow) %v297_v33, 16  ;;  %v361_v33 = vld [vmem:[%s4389_s11 + $0x380] sm:$0xff] }
  0x61   : > { %570 = vxpose.xlu0.b32.cont [2/16] (narrow) %v282_v34, 16  ;;  %v346_v34 = vld [vmem:[%s4389_s11 + $0x308] sm:$0xff] }
  0x62   : > { %602 = vxpose.xlu1.b32.cont [2/16] (narrow) %v298_v35, 16  ;;  %v362_v35 = vld [vmem:[%s4389_s11 + $0x388] sm:$0xff] }
  0x65   : > { %571 = vxpose.xlu0.b32.cont [3/16] (narrow) %v283_v36, 16  ;;  %v347_v36 = vld [vmem:[%s4389_s11 + $0x310] sm:$0xff] }
  0x66   : > { %603 = vxpose.xlu1.b32.cont [3/16] (narrow) %v299_v37, 16  ;;  %v363_v37 = vld [vmem:[%s4389_s11 + $0x390] sm:$0xff] }
  0x69   : > { %572 = vxpose.xlu0.b32.cont [4/16] (narrow) %v284_v38, 16  ;;  %v348_v38 = vld [vmem:[%s4389_s11 + $0x318] sm:$0xff] }
  0x6a   : > { %604 = vxpose.xlu1.b32.cont [4/16] (narrow) %v300_v39, 16  ;;  %v364_v39 = vld [vmem:[%s4389_s11 + $0x398] sm:$0xff] }
  0x6d   : > { %573 = vxpose.xlu0.b32.cont [5/16] (narrow) %v285_v40, 16  ;;  %v349_v40 = vld [vmem:[%s4389_s11 + $0x320] sm:$0xff] }
  0x6e   : > { %605 = vxpose.xlu1.b32.cont [5/16] (narrow) %v301_v41, 16  ;;  %v365_v41 = vld [vmem:[%s4389_s11 + $0x3a0] sm:$0xff] }
  0x71   : > { %574 = vxpose.xlu0.b32.cont [6/16] (narrow) %v286_v42, 16  ;;  %v350_v42 = vld [vmem:[%s4389_s11 + $0x328] sm:$0xff] }
  0x72   : > { %606 = vxpose.xlu1.b32.cont [6/16] (narrow) %v302_v43, 16  ;;  %v366_v43 = vld [vmem:[%s4389_s11 + $0x3a8] sm:$0xff] }
  0x75   : > { %575 = vxpose.xlu0.b32.cont [7/16] (narrow) %v287_v44, 16  ;;  %v351_v44 = vld [vmem:[%s4389_s11 + $0x330] sm:$0xff] }
  0x76   : > { %607 = vxpose.xlu1.b32.cont [7/16] (narrow) %v303_v45, 16  ;;  %v367_v45 = vld [vmem:[%s4389_s11 + $0x3b0] sm:$0xff] }
  0x79   : > { %576 = vxpose.xlu0.b32.cont [8/16] (narrow) %v288_v46, 16  ;;  %v352_v46 = vld [vmem:[%s4389_s11 + $0x338] sm:$0xff] }
  0x7a   : > { %608 = vxpose.xlu1.b32.cont [8/16] (narrow) %v304_v47, 16  ;;  %v368_v47 = vld [vmem:[%s4389_s11 + $0x3b8] sm:$0xff] }
  0x7d   : > { %577 = vxpose.xlu0.b32.cont [9/16] (narrow) %v289_v48, 16  ;;  %v353_v48 = vld [vmem:[%s4389_s11 + $0x340] sm:$0xff] }
  0x7e   : > { %609 = vxpose.xlu1.b32.cont [9/16] (narrow) %v305_v49, 16  ;;  %v369_v49 = vld [vmem:[%s4389_s11 + $0x3c0] sm:$0xff] }
  0x81   : > { %578 = vxpose.xlu0.b32.cont [10/16] (narrow) %v290_v50, 16  ;;  %v354_v50 = vld [vmem:[%s4389_s11 + $0x348] sm:$0xff] }
  0x82   : > { %610 = vxpose.xlu1.b32.cont [10/16] (narrow) %v306_v51, 16  ;;  %v370_v51 = vld [vmem:[%s4389_s11 + $0x3c8] sm:$0xff] }
  0x85   : > { %579 = vxpose.xlu0.b32.cont [11/16] (narrow) %v291_v52, 16  ;;  %v355_v52 = vld [vmem:[%s4389_s11 + $0x350] sm:$0xff] }
  0x86   : > { %611 = vxpose.xlu1.b32.cont [11/16] (narrow) %v307_v53, 16  ;;  %v371_v53 = vld [vmem:[%s4389_s11 + $0x3d0] sm:$0xff] }
  0x89   : > { %580 = vxpose.xlu0.b32.cont [12/16] (narrow) %v292_v54, 16  ;;  %v356_v54 = vld [vmem:[%s4389_s11 + $0x358] sm:$0xff] }
  0x8a   : > { %612 = vxpose.xlu1.b32.cont [12/16] (narrow) %v308_v55, 16  ;;  %v372_v55 = vld [vmem:[%s4389_s11 + $0x3d8] sm:$0xff] }
  0x8d   : > { %581 = vxpose.xlu0.b32.cont [13/16] (narrow) %v293_v56, 16  ;;  %v357_v56 = vld [vmem:[%s4389_s11 + $0x360] sm:$0xff] }
  0x8e   : > { %613 = vxpose.xlu1.b32.cont [13/16] (narrow) %v309_v57, 16  ;;  %v373_v57 = vld [vmem:[%s4389_s11 + $0x3e0] sm:$0xff] }
  0x91   : > { %582 = vxpose.xlu0.b32.cont [14/16] (narrow) %v294_v58, 16  ;;  %v358_v58 = vld [vmem:[%s4389_s11 + $0x368] sm:$0xff] }
  0x92   : > { %614 = vxpose.xlu1.b32.cont [14/16] (narrow) %v310_v59, 16  ;;  %v374_v59 = vld [vmem:[%s4389_s11 + $0x3e8] sm:$0xff] }
  0x95   : > { %583 = vxpose.xlu0.b32.cont [15/16] (narrow) %v295_v60, 16  ;;  %v359_v60 = vld [vmem:[%s4389_s11 + $0x370] sm:$0xff] }
  0x96   : > { %615 = vxpose.xlu1.b32.cont [15/16] (narrow) %v311_v61, 16  ;;  %v375_v61 = vld [vmem:[%s4389_s11 + $0x3f0] sm:$0xff] }
  0x99   : > { %584 = vxpose.xlu0.b32.end [16/16] (narrow) %v296_v62, 16  ;;  %v360_v62 = vld [vmem:[%s4389_s11 + $0x378] sm:$0xff] }
  0x9a   : > { %616 = vxpose.xlu1.b32.end [16/16] (narrow) %v312_v63, 16  ;;  %v376_v63 = vld [vmem:[%s4389_s11 + $0x3f8] sm:$0xff] }
  0x9d   : > { %633 = vxpose.xlu0.b32.start [1/16] (narrow) %v313_v0, 16  ;;  %v377_v0 = vld [vmem:[%s4389_s11 + $0x400] sm:$0xff] }
  0x9e   : > { %665 = vxpose.xlu1.b32.start [1/16] (narrow) %v329_v1, 16  ;;  %v393_v1 = vld [vmem:[%s4389_s11 + $0x480] sm:$0xff] }
  0xa1   : > { %634 = vxpose.xlu0.b32.cont [2/16] (narrow) %v314_v2, 16  ;;  %v378_v2 = vld [vmem:[%s4389_s11 + $0x408] sm:$0xff] }
  0xa2   : > { %666 = vxpose.xlu1.b32.cont [2/16] (narrow) %v330_v3, 16  ;;  %v394_v3 = vld [vmem:[%s4389_s11 + $0x488] sm:$0xff] }
  0xa5   : > { %635 = vxpose.xlu0.b32.cont [3/16] (narrow) %v315_v4, 16  ;;  %v379_v4 = vld [vmem:[%s4389_s11 + $0x410] sm:$0xff] }
  0xa6   : > { %667 = vxpose.xlu1.b32.cont [3/16] (narrow) %v331_v5, 16  ;;  %v395_v5 = vld [vmem:[%s4389_s11 + $0x490] sm:$0xff] }
  0xa9   : > { %636 = vxpose.xlu0.b32.cont [4/16] (narrow) %v316_v6, 16  ;;  %v380_v6 = vld [vmem:[%s4389_s11 + $0x418] sm:$0xff] }
  0xaa   : > { %668 = vxpose.xlu1.b32.cont [4/16] (narrow) %v332_v7, 16  ;;  %v396_v7 = vld [vmem:[%s4389_s11 + $0x498] sm:$0xff] }
  0xad   : > { %637 = vxpose.xlu0.b32.cont [5/16] (narrow) %v317_v8, 16  ;;  %v381_v8 = vld [vmem:[%s4389_s11 + $0x420] sm:$0xff] }
  0xae   : > { %669 = vxpose.xlu1.b32.cont [5/16] (narrow) %v333_v9, 16  ;;  %v397_v9 = vld [vmem:[%s4389_s11 + $0x4a0] sm:$0xff] }
  0xb1   : > { %638 = vxpose.xlu0.b32.cont [6/16] (narrow) %v318_v10, 16  ;;  %v382_v10 = vld [vmem:[%s4389_s11 + $0x428] sm:$0xff] }
  0xb2   : > { %670 = vxpose.xlu1.b32.cont [6/16] (narrow) %v334_v11, 16  ;;  %v398_v11 = vld [vmem:[%s4389_s11 + $0x4a8] sm:$0xff] }
  0xb5   : > { %639 = vxpose.xlu0.b32.cont [7/16] (narrow) %v319_v12, 16  ;;  %v383_v12 = vld [vmem:[%s4389_s11 + $0x430] sm:$0xff] }
  0xb6   : > { %671 = vxpose.xlu1.b32.cont [7/16] (narrow) %v335_v13, 16  ;;  %v399_v13 = vld [vmem:[%s4389_s11 + $0x4b0] sm:$0xff] }
  0xb9   : > { %640 = vxpose.xlu0.b32.cont [8/16] (narrow) %v320_v14, 16  ;;  %v384_v14 = vld [vmem:[%s4389_s11 + $0x438] sm:$0xff] }
  0xba   : > { %672 = vxpose.xlu1.b32.cont [8/16] (narrow) %v336_v15, 16  ;;  %v400_v15 = vld [vmem:[%s4389_s11 + $0x4b8] sm:$0xff] }
  0xbd   : > { %641 = vxpose.xlu0.b32.cont [9/16] (narrow) %v321_v16, 16  ;;  %v385_v16 = vld [vmem:[%s4389_s11 + $0x440] sm:$0xff] }
  0xbe   : > { %673 = vxpose.xlu1.b32.cont [9/16] (narrow) %v337_v17, 16  ;;  %v401_v17 = vld [vmem:[%s4389_s11 + $0x4c0] sm:$0xff] }
  0xc1   : > { %642 = vxpose.xlu0.b32.cont [10/16] (narrow) %v322_v18, 16  ;;  %v386_v18 = vld [vmem:[%s4389_s11 + $0x448] sm:$0xff] }
  0xc2   : > { %674 = vxpose.xlu1.b32.cont [10/16] (narrow) %v338_v19, 16  ;;  %v402_v19 = vld [vmem:[%s4389_s11 + $0x4c8] sm:$0xff] }
  0xc5   : > { %643 = vxpose.xlu0.b32.cont [11/16] (narrow) %v323_v20, 16  ;;  %v387_v20 = vld [vmem:[%s4389_s11 + $0x450] sm:$0xff] }
  0xc6   : > { %675 = vxpose.xlu1.b32.cont [11/16] (narrow) %v339_v21, 16  ;;  %v403_v21 = vld [vmem:[%s4389_s11 + $0x4d0] sm:$0xff] }
  0xc9   : > { %644 = vxpose.xlu0.b32.cont [12/16] (narrow) %v324_v22, 16  ;;  %v388_v22 = vld [vmem:[%s4389_s11 + $0x458] sm:$0xff] }
  0xca   : > { %676 = vxpose.xlu1.b32.cont [12/16] (narrow) %v340_v23, 16  ;;  %v404_v23 = vld [vmem:[%s4389_s11 + $0x4d8] sm:$0xff] }
  0xcd   : > { %645 = vxpose.xlu0.b32.cont [13/16] (narrow) %v325_v24, 16  ;;  %v389_v24 = vld [vmem:[%s4389_s11 + $0x460] sm:$0xff] }
  0xce   : > { %677 = vxpose.xlu1.b32.cont [13/16] (narrow) %v341_v25, 16  ;;  %v405_v25 = vld [vmem:[%s4389_s11 + $0x4e0] sm:$0xff] }
  0xd1   : > { %646 = vxpose.xlu0.b32.cont [14/16] (narrow) %v326_v26, 16  ;;  %v390_v26 = vld [vmem:[%s4389_s11 + $0x468] sm:$0xff] }
  0xd2   : > { %678 = vxpose.xlu1.b32.cont [14/16] (narrow) %v342_v27, 16  ;;  %v406_v27 = vld [vmem:[%s4389_s11 + $0x4e8] sm:$0xff] }
  0xd5   : > { %647 = vxpose.xlu0.b32.cont [15/16] (narrow) %v327_v28, 16  ;;  %v391_v28 = vld [vmem:[%s4389_s11 + $0x470] sm:$0xff] }
  0xd6   : > { %679 = vxpose.xlu1.b32.cont [15/16] (narrow) %v343_v29, 16  ;;  %v407_v29 = vld [vmem:[%s4389_s11 + $0x4f0] sm:$0xff] }
  0xd9   : > { %648 = vxpose.xlu0.b32.end [16/16] (narrow) %v328_v30, 16  ;;  %v392_v30 = vld [vmem:[%s4389_s11 + $0x478] sm:$0xff] }
  0xda   : > { %680 = vxpose.xlu1.b32.end [16/16] (narrow) %v344_v31, 16  ;;  %v408_v31 = vld [vmem:[%s4389_s11 + $0x4f8] sm:$0xff] }
  0xdd   : > { %697 = vxpose.xlu0.b32.start [1/16] (narrow) %v345_v32, 16  ;;  %v409_v32 = vld [vmem:[%s4389_s11 + $0x500] sm:$0xff] }
  0xde   : > { %729 = vxpose.xlu1.b32.start [1/16] (narrow) %v361_v33, 16  ;;  %v425_v33 = vld [vmem:[%s4389_s11 + $0x580] sm:$0xff] }
  0xe1   : > { %698 = vxpose.xlu0.b32.cont [2/16] (narrow) %v346_v34, 16  ;;  %v410_v34 = vld [vmem:[%s4389_s11 + $0x508] sm:$0xff] }
  0xe2   : > { %730 = vxpose.xlu1.b32.cont [2/16] (narrow) %v362_v35, 16  ;;  %v426_v35 = vld [vmem:[%s4389_s11 + $0x588] sm:$0xff] }
  0xe5   : > { %699 = vxpose.xlu0.b32.cont [3/16] (narrow) %v347_v36, 16  ;;  %v411_v36 = vld [vmem:[%s4389_s11 + $0x510] sm:$0xff] }
  0xe6   : > { %731 = vxpose.xlu1.b32.cont [3/16] (narrow) %v363_v37, 16  ;;  %v427_v37 = vld [vmem:[%s4389_s11 + $0x590] sm:$0xff] }
  0xe9   : > { %700 = vxpose.xlu0.b32.cont [4/16] (narrow) %v348_v38, 16  ;;  %v412_v38 = vld [vmem:[%s4389_s11 + $0x518] sm:$0xff] }
  0xea   : > { %732 = vxpose.xlu1.b32.cont [4/16] (narrow) %v364_v39, 16  ;;  %v428_v39 = vld [vmem:[%s4389_s11 + $0x598] sm:$0xff] }
  0xed   : > { %701 = vxpose.xlu0.b32.cont [5/16] (narrow) %v349_v40, 16  ;;  %v413_v40 = vld [vmem:[%s4389_s11 + $0x520] sm:$0xff] }
  0xee   : > { %733 = vxpose.xlu1.b32.cont [5/16] (narrow) %v365_v41, 16  ;;  %v429_v41 = vld [vmem:[%s4389_s11 + $0x5a0] sm:$0xff] }
  0xf1   : > { %702 = vxpose.xlu0.b32.cont [6/16] (narrow) %v350_v42, 16  ;;  %v414_v42 = vld [vmem:[%s4389_s11 + $0x528] sm:$0xff] }
  0xf2   : > { %734 = vxpose.xlu1.b32.cont [6/16] (narrow) %v366_v43, 16  ;;  %v430_v43 = vld [vmem:[%s4389_s11 + $0x5a8] sm:$0xff] }
  0xf5   : > { %703 = vxpose.xlu0.b32.cont [7/16] (narrow) %v351_v44, 16  ;;  %v415_v44 = vld [vmem:[%s4389_s11 + $0x530] sm:$0xff] }
  0xf6   : > { %735 = vxpose.xlu1.b32.cont [7/16] (narrow) %v367_v45, 16  ;;  %v431_v45 = vld [vmem:[%s4389_s11 + $0x5b0] sm:$0xff] }
  0xf9   : > { %704 = vxpose.xlu0.b32.cont [8/16] (narrow) %v352_v46, 16  ;;  %v416_v46 = vld [vmem:[%s4389_s11 + $0x538] sm:$0xff] }
  0xfa   : > { %736 = vxpose.xlu1.b32.cont [8/16] (narrow) %v368_v47, 16  ;;  %v432_v47 = vld [vmem:[%s4389_s11 + $0x5b8] sm:$0xff] }
  0xfd   : > { %705 = vxpose.xlu0.b32.cont [9/16] (narrow) %v353_v48, 16  ;;  %v417_v48 = vld [vmem:[%s4389_s11 + $0x540] sm:$0xff] }
  0xfe   : > { %737 = vxpose.xlu1.b32.cont [9/16] (narrow) %v369_v49, 16  ;;  %v433_v49 = vld [vmem:[%s4389_s11 + $0x5c0] sm:$0xff] }
 0x101   : > { %706 = vxpose.xlu0.b32.cont [10/16] (narrow) %v354_v50, 16  ;;  %v418_v50 = vld [vmem:[%s4389_s11 + $0x548] sm:$0xff] }
 0x102   : > { %738 = vxpose.xlu1.b32.cont [10/16] (narrow) %v370_v51, 16  ;;  %v434_v51 = vld [vmem:[%s4389_s11 + $0x5c8] sm:$0xff] }
 0x105   : > { %707 = vxpose.xlu0.b32.cont [11/16] (narrow) %v355_v52, 16  ;;  %v419_v52 = vld [vmem:[%s4389_s11 + $0x550] sm:$0xff] }
 0x106   : > { %739 = vxpose.xlu1.b32.cont [11/16] (narrow) %v371_v53, 16  ;;  %v435_v53 = vld [vmem:[%s4389_s11 + $0x5d0] sm:$0xff] }
 0x109   : > { %708 = vxpose.xlu0.b32.cont [12/16] (narrow) %v356_v54, 16  ;;  %v420_v54 = vld [vmem:[%s4389_s11 + $0x558] sm:$0xff] }
 0x10a   : > { %740 = vxpose.xlu1.b32.cont [12/16] (narrow) %v372_v55, 16  ;;  %v436_v55 = vld [vmem:[%s4389_s11 + $0x5d8] sm:$0xff] }
 0x10d   : > { %709 = vxpose.xlu0.b32.cont [13/16] (narrow) %v357_v56, 16  ;;  %v421_v56 = vld [vmem:[%s4389_s11 + $0x560] sm:$0xff] }
 0x10e   : > { %741 = vxpose.xlu1.b32.cont [13/16] (narrow) %v373_v57, 16  ;;  %v437_v57 = vld [vmem:[%s4389_s11 + $0x5e0] sm:$0xff] }
 0x111   : > { %710 = vxpose.xlu0.b32.cont [14/16] (narrow) %v358_v58, 16  ;;  %v422_v58 = vld [vmem:[%s4389_s11 + $0x568] sm:$0xff] }
 0x112   : > { %742 = vxpose.xlu1.b32.cont [14/16] (narrow) %v374_v59, 16  ;;  %v438_v59 = vld [vmem:[%s4389_s11 + $0x5e8] sm:$0xff] }
 0x115   : > { %711 = vxpose.xlu0.b32.cont [15/16] (narrow) %v359_v60, 16  ;;  %v423_v60 = vld [vmem:[%s4389_s11 + $0x570] sm:$0xff] }
 0x116   : > { %743 = vxpose.xlu1.b32.cont [15/16] (narrow) %v375_v61, 16  ;;  %v439_v61 = vld [vmem:[%s4389_s11 + $0x5f0] sm:$0xff] }
 0x119   : > { %712 = vxpose.xlu0.b32.end [16/16] (narrow) %v360_v62, 16  ;;  %v424_v62 = vld [vmem:[%s4389_s11 + $0x578] sm:$0xff] }
 0x11a   : > { %744 = vxpose.xlu1.b32.end [16/16] (narrow) %v376_v63, 16  ;;  %v440_v63 = vld [vmem:[%s4389_s11 + $0x5f8] sm:$0xff] }
 0x11d   : > { %761 = vxpose.xlu0.b32.start [1/16] (narrow) %v377_v0, 16  ;;  %v441_v0 = vld [vmem:[%s4389_s11 + $0x600] sm:$0xff] }
 0x11e   : > { %793 = vxpose.xlu1.b32.start [1/16] (narrow) %v393_v1, 16  ;;  %v457_v1 = vld [vmem:[%s4389_s11 + $0x680] sm:$0xff] }
 0x121   : > { %762 = vxpose.xlu0.b32.cont [2/16] (narrow) %v378_v2, 16  ;;  %v442_v2 = vld [vmem:[%s4389_s11 + $0x608] sm:$0xff] }
 0x122   : > { %794 = vxpose.xlu1.b32.cont [2/16] (narrow) %v394_v3, 16  ;;  %v458_v3 = vld [vmem:[%s4389_s11 + $0x688] sm:$0xff] }
 0x125   : > { %763 = vxpose.xlu0.b32.cont [3/16] (narrow) %v379_v4, 16  ;;  %v443_v4 = vld [vmem:[%s4389_s11 + $0x610] sm:$0xff] }
 0x126   : > { %795 = vxpose.xlu1.b32.cont [3/16] (narrow) %v395_v5, 16  ;;  %v459_v5 = vld [vmem:[%s4389_s11 + $0x690] sm:$0xff] }
 0x129   : > { %764 = vxpose.xlu0.b32.cont [4/16] (narrow) %v380_v6, 16  ;;  %v444_v6 = vld [vmem:[%s4389_s11 + $0x618] sm:$0xff] }
 0x12a   : > { %796 = vxpose.xlu1.b32.cont [4/16] (narrow) %v396_v7, 16  ;;  %v460_v7 = vld [vmem:[%s4389_s11 + $0x698] sm:$0xff] }
 0x12d   : > { %765 = vxpose.xlu0.b32.cont [5/16] (narrow) %v381_v8, 16  ;;  %v445_v8 = vld [vmem:[%s4389_s11 + $0x620] sm:$0xff] }
 0x12e   : > { %797 = vxpose.xlu1.b32.cont [5/16] (narrow) %v397_v9, 16  ;;  %v461_v9 = vld [vmem:[%s4389_s11 + $0x6a0] sm:$0xff] }
 0x131   : > { %766 = vxpose.xlu0.b32.cont [6/16] (narrow) %v382_v10, 16  ;;  %v446_v10 = vld [vmem:[%s4389_s11 + $0x628] sm:$0xff] }
 0x132   : > { %798 = vxpose.xlu1.b32.cont [6/16] (narrow) %v398_v11, 16  ;;  %v462_v11 = vld [vmem:[%s4389_s11 + $0x6a8] sm:$0xff] }
 0x135   : > { %767 = vxpose.xlu0.b32.cont [7/16] (narrow) %v383_v12, 16  ;;  %v447_v12 = vld [vmem:[%s4389_s11 + $0x630] sm:$0xff] }
 0x136   : > { %799 = vxpose.xlu1.b32.cont [7/16] (narrow) %v399_v13, 16  ;;  %v463_v13 = vld [vmem:[%s4389_s11 + $0x6b0] sm:$0xff] }
 0x139   : > { %768 = vxpose.xlu0.b32.cont [8/16] (narrow) %v384_v14, 16  ;;  %v448_v14 = vld [vmem:[%s4389_s11 + $0x638] sm:$0xff] }
 0x13a   : > { %800 = vxpose.xlu1.b32.cont [8/16] (narrow) %v400_v15, 16  ;;  %v464_v15 = vld [vmem:[%s4389_s11 + $0x6b8] sm:$0xff] }
 0x13d   : > { %769 = vxpose.xlu0.b32.cont [9/16] (narrow) %v385_v16, 16  ;;  %v449_v16 = vld [vmem:[%s4389_s11 + $0x640] sm:$0xff] }
 0x13e   : > { %801 = vxpose.xlu1.b32.cont [9/16] (narrow) %v401_v17, 16  ;;  %v465_v17 = vld [vmem:[%s4389_s11 + $0x6c0] sm:$0xff] }
 0x141   : > { %770 = vxpose.xlu0.b32.cont [10/16] (narrow) %v386_v18, 16  ;;  %v450_v18 = vld [vmem:[%s4389_s11 + $0x648] sm:$0xff] }
 0x142   : > { %802 = vxpose.xlu1.b32.cont [10/16] (narrow) %v402_v19, 16  ;;  %v466_v19 = vld [vmem:[%s4389_s11 + $0x6c8] sm:$0xff] }
 0x145   : > { %771 = vxpose.xlu0.b32.cont [11/16] (narrow) %v387_v20, 16  ;;  %v451_v20 = vld [vmem:[%s4389_s11 + $0x650] sm:$0xff] }
 0x146   : > { %803 = vxpose.xlu1.b32.cont [11/16] (narrow) %v403_v21, 16  ;;  %v467_v21 = vld [vmem:[%s4389_s11 + $0x6d0] sm:$0xff] }
 0x149   : > { %772 = vxpose.xlu0.b32.cont [12/16] (narrow) %v388_v22, 16  ;;  %v452_v22 = vld [vmem:[%s4389_s11 + $0x658] sm:$0xff] }
 0x14a   : > { %804 = vxpose.xlu1.b32.cont [12/16] (narrow) %v404_v23, 16  ;;  %v468_v23 = vld [vmem:[%s4389_s11 + $0x6d8] sm:$0xff] }
 0x14d   : > { %773 = vxpose.xlu0.b32.cont [13/16] (narrow) %v389_v24, 16  ;;  %v453_v24 = vld [vmem:[%s4389_s11 + $0x660] sm:$0xff] }
 0x14e   : > { %805 = vxpose.xlu1.b32.cont [13/16] (narrow) %v405_v25, 16  ;;  %v469_v25 = vld [vmem:[%s4389_s11 + $0x6e0] sm:$0xff] }
 0x151   : > { %774 = vxpose.xlu0.b32.cont [14/16] (narrow) %v390_v26, 16  ;;  %v454_v26 = vld [vmem:[%s4389_s11 + $0x668] sm:$0xff] }
 0x152   : > { %806 = vxpose.xlu1.b32.cont [14/16] (narrow) %v406_v27, 16  ;;  %v470_v27 = vld [vmem:[%s4389_s11 + $0x6e8] sm:$0xff] }
 0x155   : > { %775 = vxpose.xlu0.b32.cont [15/16] (narrow) %v391_v28, 16  ;;  %v455_v28 = vld [vmem:[%s4389_s11 + $0x670] sm:$0xff] }
 0x156   : > { %807 = vxpose.xlu1.b32.cont [15/16] (narrow) %v407_v29, 16  ;;  %v471_v29 = vld [vmem:[%s4389_s11 + $0x6f0] sm:$0xff] }
 0x159   : > { %776 = vxpose.xlu0.b32.end [16/16] (narrow) %v392_v30, 16  ;;  %v456_v30 = vld [vmem:[%s4389_s11 + $0x678] sm:$0xff] }
 0x15a   : > { %808 = vxpose.xlu1.b32.end [16/16] (narrow) %v408_v31, 16  ;;  %v472_v31 = vld [vmem:[%s4389_s11 + $0x6f8] sm:$0xff] }
 0x15d   : > { %825 = vxpose.xlu0.b32.start [1/16] (narrow) %v409_v32, 16  ;;  %v473_v32 = vld [vmem:[%s4389_s11 + $0x700] sm:$0xff] }
 0x15e   : > { %857 = vxpose.xlu1.b32.start [1/16] (narrow) %v425_v33, 16  ;;  %v489_v33 = vld [vmem:[%s4389_s11 + $0x780] sm:$0xff] }
 0x161   : > { %826 = vxpose.xlu0.b32.cont [2/16] (narrow) %v410_v34, 16  ;;  %v474_v34 = vld [vmem:[%s4389_s11 + $0x708] sm:$0xff] }
 0x162   : > { %858 = vxpose.xlu1.b32.cont [2/16] (narrow) %v426_v35, 16  ;;  %v490_v35 = vld [vmem:[%s4389_s11 + $0x788] sm:$0xff] }
 0x165   : > { %827 = vxpose.xlu0.b32.cont [3/16] (narrow) %v411_v36, 16  ;;  %v475_v36 = vld [vmem:[%s4389_s11 + $0x710] sm:$0xff] }
 0x166   : > { %859 = vxpose.xlu1.b32.cont [3/16] (narrow) %v427_v37, 16  ;;  %v491_v37 = vld [vmem:[%s4389_s11 + $0x790] sm:$0xff] }
 0x169   : > { %828 = vxpose.xlu0.b32.cont [4/16] (narrow) %v412_v38, 16  ;;  %v476_v38 = vld [vmem:[%s4389_s11 + $0x718] sm:$0xff] }
 0x16a   : > { %860 = vxpose.xlu1.b32.cont [4/16] (narrow) %v428_v39, 16  ;;  %v492_v39 = vld [vmem:[%s4389_s11 + $0x798] sm:$0xff] }
 0x16d   : > { %829 = vxpose.xlu0.b32.cont [5/16] (narrow) %v413_v40, 16  ;;  %v477_v40 = vld [vmem:[%s4389_s11 + $0x720] sm:$0xff] }
 0x16e   : > { %861 = vxpose.xlu1.b32.cont [5/16] (narrow) %v429_v41, 16  ;;  %v493_v41 = vld [vmem:[%s4389_s11 + $0x7a0] sm:$0xff] }
 0x171   : > { %830 = vxpose.xlu0.b32.cont [6/16] (narrow) %v414_v42, 16  ;;  %v478_v42 = vld [vmem:[%s4389_s11 + $0x728] sm:$0xff] }
 0x172   : > { %862 = vxpose.xlu1.b32.cont [6/16] (narrow) %v430_v43, 16  ;;  %v494_v43 = vld [vmem:[%s4389_s11 + $0x7a8] sm:$0xff] }
 0x175   : > { %831 = vxpose.xlu0.b32.cont [7/16] (narrow) %v415_v44, 16  ;;  %v3828_v44 = vld [vmem:[%s6022_s3 + $0x4] ss:$8 sps:$4 sm:$0xff]  }
 0x176   : > { %863 = vxpose.xlu1.b32.cont [7/16] (narrow) %v431_v45, 16  ;;  %v3830_v45 = vld [vmem:[%s6022_s3 + $0x404] ss:$8 sps:$4 sm:$0xff]   ;;  %3024 = vmatprep.subr.bf16.mxu1 %v3828_v44 }
 0x177   : > { %3196 = vmatprep.subr.bf16.mxu0 %v3830_v45 }
 0x179   : > { %832 = vxpose.xlu0.b32.cont [8/16] (narrow) %v416_v46, 16  ;;  %v3832_v46 = vld [vmem:[%s6022_s3] ss:$8 sps:$4 sm:$0xff]  }
 0x17a   : > { %864 = vxpose.xlu1.b32.cont [8/16] (narrow) %v432_v47, 16  ;;  %v3833_v47 = vld [vmem:[%s6022_s3 + $0x400] ss:$8 sps:$4 sm:$0xff]   ;;  %3025 = vmatpush1.bf16.msra.mxu1 %v3832_v46 }
 0x17b   : > { %3197 = vmatpush1.bf16.msra.mxu0 %v3833_v47 }
 0x17d   : > { %833 = vxpose.xlu0.b32.cont [9/16] (narrow) %v417_v48, 16  ;;  %v3834_v48 = vld [vmem:[%s6022_s3 + $0x14] ss:$8 sps:$4 sm:$0xff]  }
 0x17e   : > { %865 = vxpose.xlu1.b32.cont [9/16] (narrow) %v433_v49, 16  ;;  %v3836_v49 = vld [vmem:[%s6022_s3 + $0x414] ss:$8 sps:$4 sm:$0xff]   ;;  %3026 = vmatprep.subr.bf16.mxu1 %v3834_v48 }
 0x17f   : > { %3198 = vmatprep.subr.bf16.mxu0 %v3836_v49 }
 0x181   : > { %834 = vxpose.xlu0.b32.cont [10/16] (narrow) %v418_v50, 16  ;;  %v479_v50 = vld [vmem:[%s4389_s11 + $0x730] sm:$0xff] }
 0x182   : > { %866 = vxpose.xlu1.b32.cont [10/16] (narrow) %v434_v51, 16  ;;  %v495_v51 = vld [vmem:[%s4389_s11 + $0x7b0] sm:$0xff] }
 0x185   : > { %835 = vxpose.xlu0.b32.cont [11/16] (narrow) %v419_v52, 16  ;;  %v3838_v52 = vld [vmem:[%s6022_s3 + $0x10] ss:$8 sps:$4 sm:$0xff]  }
 0x186   : > { %867 = vxpose.xlu1.b32.cont [11/16] (narrow) %v435_v53, 16  ;;  %v3839_v53 = vld [vmem:[%s6022_s3 + $0x410] ss:$8 sps:$4 sm:$0xff]   ;;  %3027 = vmatpush1.bf16.msra.mxu1 %v3838_v52 }
 0x187   : > { %3199 = vmatpush1.bf16.msra.mxu0 %v3839_v53 }
 0x189   : > { %836 = vxpose.xlu0.b32.cont [12/16] (narrow) %v420_v54, 16  ;;  %v3840_v54 = vld [vmem:[%s6022_s3 + $0x24] ss:$8 sps:$4 sm:$0xff]  }
 0x18a   : > { %868 = vxpose.xlu1.b32.cont [12/16] (narrow) %v436_v55, 16  ;;  %v3842_v55 = vld [vmem:[%s6022_s3 + $0x424] ss:$8 sps:$4 sm:$0xff]   ;;  %3028 = vmatprep.subr.bf16.mxu1 %v3840_v54 }
 0x18b   : > { %3200 = vmatprep.subr.bf16.mxu0 %v3842_v55 }
 0x18d   : > { %837 = vxpose.xlu0.b32.cont [13/16] (narrow) %v421_v56, 16  ;;  %v480_v56 = vld [vmem:[%s4389_s11 + $0x738] sm:$0xff] }
 0x18e   : > { %869 = vxpose.xlu1.b32.cont [13/16] (narrow) %v437_v57, 16  ;;  %v496_v57 = vld [vmem:[%s4389_s11 + $0x7b8] sm:$0xff] }
 0x191   : > { %838 = vxpose.xlu0.b32.cont [14/16] (narrow) %v422_v58, 16  ;;  %v3844_v58 = vld [vmem:[%s6022_s3 + $0x20] ss:$8 sps:$4 sm:$0xff]  }
 0x192   : > { %870 = vxpose.xlu1.b32.cont [14/16] (narrow) %v438_v59, 16  ;;  %v3845_v59 = vld [vmem:[%s6022_s3 + $0x420] ss:$8 sps:$4 sm:$0xff]   ;;  %3029 = vmatpush1.bf16.msra.mxu1 %v3844_v58 }
 0x193   : > { %3201 = vmatpush1.bf16.msra.mxu0 %v3845_v59 }
 0x195   : > { %839 = vxpose.xlu0.b32.cont [15/16] (narrow) %v423_v60, 16  ;;  %v3846_v60 = vld [vmem:[%s6022_s3 + $0x34] ss:$8 sps:$4 sm:$0xff]  }
 0x196   : > { %871 = vxpose.xlu1.b32.cont [15/16] (narrow) %v439_v61, 16  ;;  %v3848_v61 = vld [vmem:[%s6022_s3 + $0x434] ss:$8 sps:$4 sm:$0xff]   ;;  %3030 = vmatprep.subr.bf16.mxu1 %v3846_v60 }
 0x197   : > { %3202 = vmatprep.subr.bf16.mxu0 %v3848_v61 }
 0x199   : > { %840 = vxpose.xlu0.b32.end [16/16] (narrow) %v424_v62, 16  ;;  %v481_v62 = vld [vmem:[%s4389_s11 + $0x740] sm:$0xff] }
 0x19a   : > { %872 = vxpose.xlu1.b32.end [16/16] (narrow) %v440_v63, 16  ;;  %v497_v63 = vld [vmem:[%s4389_s11 + $0x7c0] sm:$0xff] }
 0x19d   : > { %889 = vxpose.xlu0.b32.start [1/16] (narrow) %v441_v0, 16  ;;  %v3850_v0 = vld [vmem:[%s6022_s3 + $0x30] ss:$8 sps:$4 sm:$0xff]  }
 0x19e   : > { %921 = vxpose.xlu1.b32.start [1/16] (narrow) %v457_v1, 16  ;;  %v3851_v1 = vld [vmem:[%s6022_s3 + $0x430] ss:$8 sps:$4 sm:$0xff]   ;;  %3031 = vmatpush1.bf16.msra.mxu1 %v3850_v0 }
 0x19f   : > { %3203 = vmatpush1.bf16.msra.mxu0 %v3851_v1 }
 0x1a1   : > { %890 = vxpose.xlu0.b32.cont [2/16] (narrow) %v442_v2, 16  ;;  %v3852_v2 = vld [vmem:[%s6022_s3 + $0x44] ss:$8 sps:$4 sm:$0xff]  }
 0x1a2   : > { %922 = vxpose.xlu1.b32.cont [2/16] (narrow) %v458_v3, 16  ;;  %v3854_v3 = vld [vmem:[%s6022_s3 + $0x444] ss:$8 sps:$4 sm:$0xff]   ;;  %3032 = vmatprep.subr.bf16.mxu1 %v3852_v2 }
 0x1a3   : > { %3204 = vmatprep.subr.bf16.mxu0 %v3854_v3 }
 0x1a5   : > { %891 = vxpose.xlu0.b32.cont [3/16] (narrow) %v443_v4, 16  ;;  %v482_v4 = vld [vmem:[%s4389_s11 + $0x748] sm:$0xff] }
 0x1a6   : > { %923 = vxpose.xlu1.b32.cont [3/16] (narrow) %v459_v5, 16  ;;  %v498_v5 = vld [vmem:[%s4389_s11 + $0x7c8] sm:$0xff] }
 0x1a9   : > { %892 = vxpose.xlu0.b32.cont [4/16] (narrow) %v444_v6, 16  ;;  %v3856_v6 = vld [vmem:[%s6022_s3 + $0x40] ss:$8 sps:$4 sm:$0xff]  }
 0x1aa   : > { %924 = vxpose.xlu1.b32.cont [4/16] (narrow) %v460_v7, 16  ;;  %v3857_v7 = vld [vmem:[%s6022_s3 + $0x440] ss:$8 sps:$4 sm:$0xff]   ;;  %3033 = vmatpush1.bf16.msra.mxu1 %v3856_v6 }
 0x1ab   : > { %3205 = vmatpush1.bf16.msra.mxu0 %v3857_v7 }
 0x1ad   : > { %893 = vxpose.xlu0.b32.cont [5/16] (narrow) %v445_v8, 16  ;;  %v3858_v8 = vld [vmem:[%s6022_s3 + $0x54] ss:$8 sps:$4 sm:$0xff]  }
 0x1ae   : > { %925 = vxpose.xlu1.b32.cont [5/16] (narrow) %v461_v9, 16  ;;  %v3860_v9 = vld [vmem:[%s6022_s3 + $0x454] ss:$8 sps:$4 sm:$0xff]   ;;  %3034 = vmatprep.subr.bf16.mxu1 %v3858_v8 }
 0x1af   : > { %3206 = vmatprep.subr.bf16.mxu0 %v3860_v9 }
 0x1b1   : > { %894 = vxpose.xlu0.b32.cont [6/16] (narrow) %v446_v10, 16  ;;  %v483_v10 = vld [vmem:[%s4389_s11 + $0x750] sm:$0xff] }
 0x1b2   : > { %926 = vxpose.xlu1.b32.cont [6/16] (narrow) %v462_v11, 16  ;;  %v499_v11 = vld [vmem:[%s4389_s11 + $0x7d0] sm:$0xff] }
 0x1b5   : > { %895 = vxpose.xlu0.b32.cont [7/16] (narrow) %v447_v12, 16  ;;  %v3862_v12 = vld [vmem:[%s6022_s3 + $0x50] ss:$8 sps:$4 sm:$0xff]  }
 0x1b6   : > { %927 = vxpose.xlu1.b32.cont [7/16] (narrow) %v463_v13, 16  ;;  %v3863_v13 = vld [vmem:[%s6022_s3 + $0x450] ss:$8 sps:$4 sm:$0xff]   ;;  %3035 = vmatpush1.bf16.msra.mxu1 %v3862_v12 }
 0x1b7   : > { %3207 = vmatpush1.bf16.msra.mxu0 %v3863_v13 }
 0x1b9   : > { %896 = vxpose.xlu0.b32.cont [8/16] (narrow) %v448_v14, 16  ;;  %v484_v14 = vld [vmem:[%s4389_s11 + $0x758] sm:$0xff] }
 0x1ba   : > { %928 = vxpose.xlu1.b32.cont [8/16] (narrow) %v464_v15, 16  ;;  %v500_v15 = vld [vmem:[%s4389_s11 + $0x7d8] sm:$0xff] }
 0x1bd   : > { %897 = vxpose.xlu0.b32.cont [9/16] (narrow) %v449_v16, 16  ;;  %v485_v16 = vld [vmem:[%s4389_s11 + $0x760] sm:$0xff] }
 0x1be   : > { %929 = vxpose.xlu1.b32.cont [9/16] (narrow) %v465_v17, 16  ;;  %v501_v17 = vld [vmem:[%s4389_s11 + $0x7e0] sm:$0xff] }
 0x1c1   : > { %898 = vxpose.xlu0.b32.cont [10/16] (narrow) %v450_v18, 16  ;;  %v4713_v18 = vpop.trf.xlu0 }
 0x1c2   : > { %930 = vxpose.xlu1.b32.cont [10/16] (narrow) %v466_v19, 16  ;;  %v4715_v19 = vpop.trf.xlu1 }
 0x1c5   : > { %899 = vxpose.xlu0.b32.cont [11/16] (narrow) %v451_v20, 16  ;;  %v486_v20 = vld [vmem:[%s4389_s11 + $0x768] sm:$0xff] }
 0x1c6   : > { %931 = vxpose.xlu1.b32.cont [11/16] (narrow) %v467_v21, 16  ;;  %v502_v21 = vld [vmem:[%s4389_s11 + $0x7e8] sm:$0xff] }
 0x1c9   : > { %900 = vxpose.xlu0.b32.cont [12/16] (narrow) %v452_v22, 16  ;;  %v4719_v22 = vpop.trf.xlu0 }
 0x1ca   : > { %932 = vxpose.xlu1.b32.cont [12/16] (narrow) %v468_v23, 16  ;;  %v4721_v23 = vpop.trf.xlu1 }
 0x1cb   : > { %v1071_v44 = vmul.f32 %v4721_v23, %v4721_v23 }
 0x1cd   : > { %901 = vxpose.xlu0.b32.cont [13/16] (narrow) %v453_v24, 16  ;;  %v487_v24 = vld [vmem:[%s4389_s11 + $0x770] sm:$0xff] }
 0x1ce   : > { %933 = vxpose.xlu1.b32.cont [13/16] (narrow) %v469_v25, 16  ;;  %v503_v25 = vld [vmem:[%s4389_s11 + $0x7f0] sm:$0xff] }
 0x1d1   : > { %902 = vxpose.xlu0.b32.cont [14/16] (narrow) %v454_v26, 16  ;;  %v488_v26 = vld [vmem:[%s4389_s11 + $0x778] sm:$0xff] }
 0x1d2   : > { %934 = vxpose.xlu1.b32.cont [14/16] (narrow) %v470_v27, 16  ;;  %v504_v27 = vld [vmem:[%s4389_s11 + $0x7f8] sm:$0xff] }
 0x1d5   : > { %903 = vxpose.xlu0.b32.cont [15/16] (narrow) %v455_v28, 16  ;;  %v4727_v28 = vpop.trf.xlu0 }
 0x1d6   : > { %935 = vxpose.xlu1.b32.cont [15/16] (narrow) %v471_v29, 16  ;;  %v4729_v29 = vpop.trf.xlu1  ;;  %v1056_v46 = vmul.f32 %v4727_v28, %v4727_v28 }
 0x1d7   : > { %v1057_v54 = vmul.f32 %v4729_v29, %v4729_v29 }
 0x1d9   : > { %904 = vxpose.xlu0.b32.end [16/16] (narrow) %v456_v30, 16  ;;  %v4731_v30 = vpop.trf.xlu0 }
 0x1da   : > { %936 = vxpose.xlu1.b32.end [16/16] (narrow) %v472_v31, 16  ;;  %v4733_v31 = vpop.trf.xlu1 }
 0x1db   : > { %v1073_v58 = vmul.f32 %v4733_v31, %v4733_v31 }
 0x1dd   : > { %953 = vxpose.xlu0.b32.start [1/16] (narrow) %v473_v32, 16  ;;  %v4735_v32 = vpop.trf.xlu0 }
 0x1de   : > { %985 = vxpose.xlu1.b32.start [1/16] (narrow) %v489_v33, 16  ;;  %v4737_v33 = vpop.trf.xlu1  ;;  %v1058_v60 = vmul.f32 %v4735_v32, %v4735_v32 }
 0x1e1   : > { %954 = vxpose.xlu0.b32.cont [2/16] (narrow) %v474_v34, 16  ;;  %v4739_v34 = vpop.trf.xlu0 }
 0x1e2   : > { %986 = vxpose.xlu1.b32.cont [2/16] (narrow) %v490_v35, 16  ;;  %v4741_v35 = vpop.trf.xlu1  ;;  %v1074_v2 = vmul.f32 %v4739_v34, %v4739_v34 }
 0x1e3   : > { %v1075_v8 = vmul.f32 %v4741_v35, %v4741_v35 }
 0x1e5   : > { %955 = vxpose.xlu0.b32.cont [3/16] (narrow) %v475_v36, 16  ;;  %v1017_v36 = vadd.f32 %v4715_v19, %v4713_v18 }
 0x1e6   : > { %987 = vxpose.xlu1.b32.cont [3/16] (narrow) %v491_v37, 16  ;;  %v1054_v37 = vmul.f32 %v4713_v18, %v4713_v18 }
 0x1e9   : > { %956 = vxpose.xlu0.b32.cont [4/16] (narrow) %v476_v38, 16  ;;  %v1055_v38 = vmul.f32 %v4715_v19, %v4715_v19 }
 0x1ea   : > { %988 = vxpose.xlu1.b32.cont [4/16] (narrow) %v492_v39, 16  ;;  %v4749_v39 = vpop.trf.xlu0 }
 0x1eb   : > { %6045 = vst [vmem:[#allocation5_spill] sm:$0xff] %v4749_v39  ;;  %v1086_v45 = vadd.f32 %v1055_v38, %v1054_v37  ;;  %v1060_v12 = vmul.f32 %v4749_v39, %v4749_v39 }
 0x1ed   : > { %957 = vxpose.xlu0.b32.cont [5/16] (narrow) %v477_v40, 16  ;;  %v4751_v40 = vpop.trf.xlu1  ;;  %v1087_v53 = vadd.f32 %v1086_v45, %v1056_v46 }
 0x1ee   : > { %989 = vxpose.xlu1.b32.cont [5/16] (narrow) %v493_v41, 16  ;;  %v1034_v41 = vadd.f32 %v4721_v23, %v4719_v22 }
 0x1ef   : > { %v1088_v59 = vadd.f32 %v1087_v53, %v1057_v54 }
 0x1f0   : > { %v1035_v48 = vadd.f32 %v1034_v41, %v4731_v30 }
 0x1f1   : > { %958 = vxpose.xlu0.b32.cont [6/16] (narrow) %v478_v42, 16  ;;  %v1018_v42 = vadd.f32 %v1017_v36, %v4727_v28  ;;  %v4768_v52 = vpop.trf.xlu1  ;;  %v1089_v3 = vadd.f32 %v1088_v59, %v1058_v60 }
 0x1f2   : > { %990 = vxpose.xlu1.b32.cont [6/16] (narrow) %v494_v43, 16  ;;  %v1070_v43 = vmul.f32 %v4719_v22, %v4719_v22  ;;  %v1036_v55 = vadd.f32 %v1035_v48, %v4733_v31  ;;  %v1077_v36 = vmul.f32 %v4768_v52, %v4768_v52 }
 0x1f3   : > { %v1019_v47 = vadd.f32 %v1018_v42, %v4729_v29 }
 0x1f4   : > { %v1103_v49 = vadd.f32 %v1071_v44, %v1070_v43  ;;  %v1037_v0 = vadd.f32 %v1036_v55, %v4739_v34 }
 0x1f5   : > { %959 = vxpose.xlu0.b32.cont [7/16] (narrow) %v479_v50, 16  ;;  %v1072_v50 = vmul.f32 %v4731_v30, %v4731_v30 }
 0x1f6   : > { %991 = vxpose.xlu1.b32.cont [7/16] (narrow) %v495_v51, 16  ;;  %v4766_v51 = vpop.trf.xlu0 }
 0x1f7   : > { %6046 = vst [vmem:[#allocation6_spill] sm:$0xff] %v4766_v51 }
 0x1f9   : > { %960 = vxpose.xlu0.b32.cont [8/16] (narrow) %v480_v56, 16  ;;  %v1020_v56 = vadd.f32 %v1019_v47, %v4735_v32 }
 0x1fa   : > { %992 = vxpose.xlu1.b32.cont [8/16] (narrow) %v496_v57, 16  ;;  %v1104_v57 = vadd.f32 %v1103_v49, %v1072_v50  ;;  %v4778_v61 = vpop.trf.xlu0 }
 0x1fb   : > { %v1062_v38 = vmul.f32 %v4778_v61, %v4778_v61 }
 0x1fc   : > { %v1105_v1 = vadd.f32 %v1104_v57, %v1073_v58 }
 0x1fd   : > { %961 = vxpose.xlu0.b32.cont [9/16] (narrow) %v481_v62, 16  ;;  %v4780_v62 = vpop.trf.xlu1 }
 0x1fe   : > { %993 = vxpose.xlu1.b32.cont [9/16] (narrow) %v497_v63, 16  ;;  %v1021_v63 = vadd.f32 %v1020_v56, %v4737_v33  ;;  %v1106_v7 = vadd.f32 %v1105_v1, %v1074_v2  ;;  %v4792_v9 = vpop.trf.xlu0  ;;  %v1063_v48 = vmul.f32 %v4780_v62, %v4780_v62 }
 0x1ff   : > { %v1078_v44 = vmul.f32 %v4792_v9, %v4792_v9 }
 0x200   : > { %v1022_v6 = vadd.f32 %v1021_v63, %v4749_v39 }
 0x201   : > { %962 = vxpose.xlu0.b32.cont [10/16] (narrow) %v482_v4, 16  ;;  %v1059_v4 = vmul.f32 %v4737_v33, %v4737_v33 }
 0x202   : > { %994 = vxpose.xlu1.b32.cont [10/16] (narrow) %v498_v5, 16  ;;  %v1038_v5 = vadd.f32 %v1037_v0, %v4741_v35  ;;  %v1023_v13 = vadd.f32 %v1022_v6, %v4751_v40 }
 0x205   : > { %963 = vxpose.xlu0.b32.cont [11/16] (narrow) %v483_v10, 16  ;;  %v4794_v10 = vpop.trf.xlu1 }
 0x206   : > { %995 = vxpose.xlu1.b32.cont [11/16] (narrow) %v499_v11, 16  ;;  %v1090_v11 = vadd.f32 %v1089_v3, %v1059_v4  ;;  %v1079_v54 = vmul.f32 %v4794_v10, %v4794_v10 }
 0x209   : > { %964 = vxpose.xlu0.b32.cont [12/16] (narrow) %v484_v14, 16  ;;  %v1039_v14 = vadd.f32 %v1038_v5, %v4766_v51 }
 0x20a   : > { %996 = vxpose.xlu1.b32.cont [12/16] (narrow) %v500_v15, 16  ;;  %v1107_v15 = vadd.f32 %v1106_v7, %v1075_v8 }
 0x20d   : > { %965 = vxpose.xlu0.b32.cont [13/16] (narrow) %v485_v16, 16  ;;  %v1076_v16 = vmul.f32 %v4766_v51, %v4766_v51 }
 0x20e   : > { %997 = vxpose.xlu1.b32.cont [13/16] (narrow) %v501_v17, 16  ;;  %v1091_v17 = vadd.f32 %v1090_v11, %v1060_v12 }
 0x211   : > { %966 = vxpose.xlu0.b32.cont [14/16] (narrow) %v486_v20, 16  ;;  %v1061_v20 = vmul.f32 %v4751_v40, %v4751_v40 }
 0x212   : > { %998 = vxpose.xlu1.b32.cont [14/16] (narrow) %v502_v21, 16  ;;  %v4804_v21 = vpop.trf.xlu0 }
 0x213   : > { %v1092_v37 = vadd.f32 %v1091_v17, %v1061_v20  ;;  %v1064_v56 = vmul.f32 %v4804_v21, %v4804_v21 }
 0x215   : > { %967 = vxpose.xlu0.b32.cont [15/16] (narrow) %v487_v24, 16  ;;  %v4806_v24 = vpop.trf.xlu1  ;;  %v1093_v47 = vadd.f32 %v1092_v37, %v1062_v38 }
 0x216   : > { %999 = vxpose.xlu1.b32.cont [15/16] (narrow) %v503_v25, 16  ;;  %v1040_v25 = vadd.f32 %v1039_v14, %v4768_v52  ;;  %v4818_v45 = vpop.trf.xlu0  ;;  %v1065_v2 = vmul.f32 %v4806_v24, %v4806_v24 }
 0x217   : > { %v1094_v55 = vadd.f32 %v1093_v47, %v1063_v48  ;;  %v1080_v0 = vmul.f32 %v4818_v45, %v4818_v45 }
 0x218   : > { %v1041_v42 = vadd.f32 %v1040_v25, %v4792_v9 }
 0x219   : > { %968 = vxpose.xlu0.b32.end [16/16] (narrow) %v488_v26, 16  ;;  %v1024_v26 = vadd.f32 %v1023_v13, %v4778_v61  ;;  %v4820_v46 = vpop.trf.xlu1  ;;  %v1095_v1 = vadd.f32 %v1094_v55, %v1064_v56 }
 0x21a   : > { %1000 = vxpose.xlu1.b32.end [16/16] (narrow) %v504_v27, 16  ;;  %v1108_v27 = vadd.f32 %v1107_v15, %v1076_v16  ;;  %v1042_v49 = vadd.f32 %v1041_v42, %v4794_v10  ;;  %v1081_v6 = vmul.f32 %v4820_v46, %v4820_v46 }
 0x21b   : > { %v1025_v41 = vadd.f32 %v1024_v26, %v4780_v62  ;;  %v1096_v11 = vadd.f32 %v1095_v1, %v1065_v2  ;;  %v3866_v1 = vld [vmem:[%s6022_s3 + $0x464] ss:$8 sps:$4 sm:$0xff]   ;;  %v3868_v2 = vld [vmem:[%s6022_s3 + $0x60] ss:$8 sps:$4 sm:$0xff]  }
 0x21c   : > { %v1109_v43 = vadd.f32 %v1108_v27, %v1077_v36  ;;  %v1043_v60 = vadd.f32 %v1042_v49, %v4818_v45  ;;  %3208 = vmatprep.subr.bf16.mxu0 %v3866_v1  ;;  %v3912_v1 = vld [vmem:[%s6022_s3 + $0xe4] ss:$8 sps:$4 sm:$0xff]  }
 0x21d   : > { %v1026_v50 = vadd.f32 %v1025_v41, %v4804_v21  ;;  %v4830_v57 = vpop.trf.xlu0 }
 0x21e   : > { %v1110_v53 = vadd.f32 %v1109_v43, %v1078_v44  ;;  %v4832_v58 = vpop.trf.xlu1  ;;  %v1044_v3 = vadd.f32 %v1043_v60, %v4820_v46  ;;  %v1066_v12 = vmul.f32 %v4830_v57, %v4830_v57 }
 0x21f   : > { %v1027_v59 = vadd.f32 %v1026_v50, %v4806_v24  ;;  %v1067_v25 = vmul.f32 %v4832_v58, %v4832_v58 }
 0x220   : > { %v1111_v63 = vadd.f32 %v1110_v53, %v1079_v54  ;;  %v1097_v20 = vadd.f32 %v1096_v11, %v1066_v12  ;;  %v3875_v11 = vld [vmem:[%s6022_s3 + $0x470] ss:$8 sps:$4 sm:$0xff]   ;;  %v3876_v12 = vld [vmem:[%s6022_s3 + $0x84] ss:$8 sps:$4 sm:$0xff]  }
 0x221   : > { %v1028_v4 = vadd.f32 %v1027_v59, %v4830_v57  ;;  %v4844_v7 = vpop.trf.xlu0 }
 0x222   : > { %v1112_v5 = vadd.f32 %v1111_v63, %v1080_v0  ;;  %v4846_v8 = vpop.trf.xlu1  ;;  %v1045_v14 = vadd.f32 %v1044_v3, %v4844_v7  ;;  %v1082_v26 = vmul.f32 %v4844_v7, %v4844_v7  ;;  %v1098_v48 = vadd.f32 %v1097_v20, %v1067_v25  ;;  %v3864_v0 = vld [vmem:[%s6022_s3 + $0x64] ss:$8 sps:$4 sm:$0xff]   ;;  %v3869_v3 = vld [vmem:[%s6022_s3 + $0x460] ss:$8 sps:$4 sm:$0xff]   ;;  %v3882_v20 = vld [vmem:[%s6022_s3 + $0x94] ss:$8 sps:$4 sm:$0xff]  }
 0x223   : > { %v1029_v13 = vadd.f32 %v1028_v4, %v4832_v58  ;;  %v1083_v44 = vmul.f32 %v4846_v8, %v4846_v8  ;;  %3036 = vmatprep.subr.bf16.mxu1 %v3864_v0  ;;  %3209 = vmatpush1.bf16.msra.mxu0 %v3869_v3  ;;  %v3870_v4 = vld [vmem:[%s6022_s3 + $0x74] ss:$8 sps:$4 sm:$0xff]   ;;  %v3911_v0 = vld [vmem:[%s6022_s3 + $0x4d0] ss:$8 sps:$4 sm:$0xff]  }
 0x224   : > { %v1113_v15 = vadd.f32 %v1112_v5, %v1081_v6  ;;  %v1046_v36 = vadd.f32 %v1045_v14, %v4846_v8  ;;  %3037 = vmatpush1.bf16.msra.mxu1 %v3868_v2  ;;  %v3872_v5 = vld [vmem:[%s6022_s3 + $0x474] ss:$8 sps:$4 sm:$0xff]   ;;  %v3874_v6 = vld [vmem:[%s6022_s3 + $0x70] ss:$8 sps:$4 sm:$0xff]   ;;  %v3880_v14 = vld [vmem:[%s6022_s3 + $0x80] ss:$8 sps:$4 sm:$0xff]  }
 0x225   : > { %3038 = vmatprep.subr.bf16.mxu1 %v3870_v4  ;;  %3210 = vmatprep.subr.bf16.mxu0 %v3872_v5  ;;  %v3884_v25 = vld [vmem:[%s6022_s3 + $0x494] ss:$8 sps:$4 sm:$0xff]   ;;  %v3914_v2 = vld [vmem:[%s6022_s3 + $0x4e4] ss:$8 sps:$4 sm:$0xff]   ;;  %v3916_v4 = vld [vmem:[%s6022_s3 + $0xe0] ss:$8 sps:$4 sm:$0xff]  }
 0x226   : > { %v1114_v43 = vadd.f32 %v1113_v15, %v1082_v26  ;;  %v3881_v15 = vld [vmem:[%s6022_s3 + $0x480] ss:$8 sps:$4 sm:$0xff]   ;;  %v3886_v26 = vld [vmem:[%s6022_s3 + $0x90] ss:$8 sps:$4 sm:$0xff]  }
 0x227   : > { %3211 = vmatpush1.bf16.msra.mxu0 %v3875_v11  ;;  %v3917_v5 = vld [vmem:[%s6022_s3 + $0x4e0] ss:$8 sps:$4 sm:$0xff]   ;;  %v3920_v11 = vld [vmem:[%s6022_s3 + $0x4f4] ss:$8 sps:$4 sm:$0xff]  }
 0x228   : > { %v1115_v55 = vadd.f32 %v1114_v43, %v1083_v44  ;;  %3039 = vmatpush1.bf16.msra.mxu1 %v3874_v6  ;;  %v3893_v43 = vld [vmem:[%s6022_s3 + $0x4a0] ss:$8 sps:$4 sm:$0xff]   ;;  %v3894_v44 = vld [vmem:[%s6022_s3 + $0xb4] ss:$8 sps:$4 sm:$0xff]  }
 0x229   : > { %3040 = vmatprep.subr.bf16.mxu1 %v3876_v12  ;;  %v3918_v6 = vld [vmem:[%s6022_s3 + $0xf4] ss:$8 sps:$4 sm:$0xff]   ;;  %v4998_v12 = vld [vmem:[%s6020_s1] sm:$0xff] }
 0x22c   : > { %3041 = vmatpush1.bf16.msra.mxu1 %v3880_v14 }
 0x22d   : > { %3042 = vmatprep.subr.bf16.mxu1 %v3882_v20  ;;  %v5010_v20 = vld [vmem:[%s6021_s2] sm:$0xff] }
 0x230   : > { %3043 = vmatpush1.bf16.msra.mxu1 %v3886_v26 }
 0x25d   : > { %v4852_v16 = vpop.trf.xlu0 }
 0x25e   : > { %6047 = vst [vmem:[#allocation7_spill] sm:$0xff] %v4852_v16  ;;  %v4854_v17 = vpop.trf.xlu1  ;;  %v1030_v27 = vadd.f32 %v1029_v13, %v4852_v16  ;;  %v1068_v37 = vmul.f32 %v4852_v16, %v4852_v16  ;;  %v3878_v13 = vld [vmem:[%s6022_s3 + $0x484] ss:$8 sps:$4 sm:$0xff]  }
 0x25f   : > { %v1069_v53 = vmul.f32 %v4854_v17, %v4854_v17  ;;  %3212 = vmatprep.subr.bf16.mxu0 %v3878_v13  ;;  %v3922_v13 = vld [vmem:[%s6022_s3 + $0xf0] ss:$8 sps:$4 sm:$0xff]  }
 0x260   : > { %v1031_v38 = vadd.f32 %v1030_v27, %v4854_v17  ;;  %v1099_v54 = vadd.f32 %v1098_v48, %v1068_v37  ;;  %3213 = vmatpush1.bf16.msra.mxu0 %v3881_v15  ;;  %v3887_v27 = vld [vmem:[%s6022_s3 + $0x490] ss:$8 sps:$4 sm:$0xff]   ;;  %v3890_v37 = vld [vmem:[%s6022_s3 + $0x4a4] ss:$8 sps:$4 sm:$0xff]  }
 0x261   : > { %v4865_v41 = vpop.trf.xlu0  ;;  %3214 = vmatprep.subr.bf16.mxu0 %v3884_v25  ;;  %v3898_v48 = vld [vmem:[%s6022_s3 + $0xb0] ss:$8 sps:$4 sm:$0xff]   ;;  %v5015_v25 = vld [vmem:[%s6020_s1 + $0x8] sm:$0xff] }
 0x262   : > { %6048 = vst [vmem:[#allocation8_spill] sm:$0xff] %v4865_v41  ;;  %v4867_v42 = vpop.trf.xlu1  ;;  %1032 = vadd.xlane.f32.xlu0 %v1031_v38  ;;  %v1047_v47 = vadd.f32 %v1046_v36, %v4865_v41  ;;  %v1084_v49 = vmul.f32 %v4865_v41, %v4865_v41  ;;  %v1100_v56 = vadd.f32 %v1099_v54, %v1069_v53  ;;  %v3888_v36 = vld [vmem:[%s6022_s3 + $0xa4] ss:$8 sps:$4 sm:$0xff]   ;;  %v3892_v38 = vld [vmem:[%s6022_s3 + $0xa0] ss:$8 sps:$4 sm:$0xff]  }
 0x263   : > { %v1085_v59 = vmul.f32 %v4867_v42, %v4867_v42  ;;  %3044 = vmatprep.subr.bf16.mxu1 %v3888_v36  ;;  %v3902_v53 = vld [vmem:[%s6022_s3 + $0x4c4] ss:$8 sps:$4 sm:$0xff]   ;;  %v3904_v54 = vld [vmem:[%s6022_s3 + $0xc0] ss:$8 sps:$4 sm:$0xff]   ;;  %v3923_v15 = vld [vmem:[%s6022_s3 + $0x4f0] ss:$8 sps:$4 sm:$0xff]  }
 0x264   : > { %v1048_v50 = vadd.f32 %v1047_v47, %v4867_v42  ;;  %v1116_v60 = vadd.f32 %v1115_v55, %v1084_v49  ;;  %3215 = vmatpush1.bf16.msra.mxu0 %v3887_v27  ;;  %3045 = vmatpush1.bf16.msra.mxu1 %v3892_v38  ;;  %v3896_v47 = vld [vmem:[%s6022_s3 + $0x4b4] ss:$8 sps:$4 sm:$0xff]   ;;  %v3899_v49 = vld [vmem:[%s6022_s3 + $0x4b0] ss:$8 sps:$4 sm:$0xff]   ;;  %v3905_v55 = vld [vmem:[%s6022_s3 + $0x4c0] ss:$8 sps:$4 sm:$0xff]  }
 0x265   : > { %3216 = vmatprep.subr.bf16.mxu0 %v3890_v37  ;;  %3046 = vmatprep.subr.bf16.mxu1 %v3894_v44  ;;  %v1313_v27 = vld [vmem:[%s6021_s2 + $0x8] sm:$0xff] }
 0x266   : > { %1049 = vadd.xlane.f32.xlu1 %v1048_v50  ;;  %v1117_v63 = vadd.f32 %v1116_v60, %v1085_v59  ;;  %v3900_v50 = vld [vmem:[%s6022_s3 + $0xc4] ss:$8 sps:$4 sm:$0xff]   ;;  %v3908_v59 = vld [vmem:[%s6022_s3 + $0x4d4] ss:$8 sps:$4 sm:$0xff]   ;;  %v1200_v60 = vlaneseq }
 0x267   : > { %v3926_v38 = vld [vmem:[%s6022_s3 + $0x104] ss:$8 sps:$4 sm:$0xff]  }
 0x268   : > { %3217 = vmatpush1.bf16.msra.mxu0 %v3893_v43  ;;  %3047 = vmatpush1.bf16.msra.mxu1 %v3898_v48  ;;  %v4981_v3 = vshrl.u32 %v1200_v60, 7  ;;  %v3929_v43 = vld [vmem:[%s6022_s3 + $0x504] ss:$8 sps:$4 sm:$0xff]  }
 0x269   : > { %3218 = vmatprep.subr.bf16.mxu0 %v3896_v47  ;;  %3048 = vmatprep.subr.bf16.mxu1 %v3900_v50 }
 0x26a   : > { %1101 = vadd.xlane.f32.xlu1 %v1100_v56  ;;  %v3906_v56 = vld [vmem:[%s6022_s3 + $0xd4] ss:$8 sps:$4 sm:$0xff]   ;;  %v1210_v14 = vsub.s32 2, %v4981_v3  ;;  %v1222_v47 = vsub.s32 5, %v4981_v3  ;;  %v1218_v50 = vsub.s32 4, %v4981_v3  ;;  %v1230_v60 = vsub.s32 7, %v4981_v3 }
 0x26c   : > { %3219 = vmatpush1.bf16.msra.mxu0 %v3899_v49  ;;  %3049 = vmatpush1.bf16.msra.mxu1 %v3904_v54  ;;  %v5018_v26 = vrot.slane %v4998_v12, %v1210_v14  ;;  %v5024_v36 = vrot.slane %v5010_v20, %v1210_v14  ;;  %v5027_v37 = vrot.slane %v5015_v25, %v1210_v14 }
 0x26d   : > { %3220 = vmatprep.subr.bf16.mxu0 %v3902_v53  ;;  %3050 = vmatprep.subr.bf16.mxu1 %v3906_v56  ;;  %v5035_v44 = vrot.slane %v1313_v27, %v1210_v14  ;;  %v5039_v48 = vrot.slane %v4998_v12, %v1222_v47  ;;  %v5042_v49 = vrot.slane %v5010_v20, %v1222_v47 }
 0x26e   : > { %1118 = vadd.xlane.f32.xlu1 %v1117_v63  ;;  %v3910_v63 = vld [vmem:[%s6022_s3 + $0xd0] ss:$8 sps:$4 sm:$0xff]   ;;  %v5046_v53 = vrot.slane %v5015_v25, %v1222_v47  ;;  %v5049_v54 = vrot.slane %v4998_v12, %v1218_v50  ;;  %v5054_v56 = vrot.slane %v5010_v20, %v1218_v50 }
 0x270   : > { %3221 = vmatpush1.bf16.msra.mxu0 %v3905_v55  ;;  %3051 = vmatpush1.bf16.msra.mxu1 %v3910_v63  ;;  %v5051_v55 = vrot.slane %v1313_v27, %v1222_v47  ;;  %6050 = vst [vmem:[#allocation10_spill] sm:$0xff] %v5054_v56  ;;  %v5060_v63 = vrot.slane %v1313_v27, %v1218_v50 }
 0x271   : > { %3222 = vmatprep.subr.bf16.mxu0 %v3908_v59  ;;  %3052 = vmatprep.subr.bf16.mxu1 %v3912_v1  ;;  %v5057_v59 = vrot.slane %v5015_v25, %v1218_v50  ;;  %v5066_v1 = vrot.slane %v5010_v20, %v1230_v60 }
 0x272   : > { %6049 = vst [vmem:[#allocation9_spill] sm:$0xff] %v5051_v55  ;;  %6052 = vst [vmem:[#allocation12_spill] sm:$0xff] %v5060_v63 }
 0x273   : > { %6051 = vst [vmem:[#allocation11_spill] sm:$0xff] %v5057_v59  ;;  %6054 = vst [vmem:[#allocation14_spill] sm:$0xff] %v5066_v1 }
 0x274   : > { %3223 = vmatpush1.bf16.msra.mxu0 %v3911_v0  ;;  %3053 = vmatpush1.bf16.msra.mxu1 %v3916_v4  ;;  %v5063_v0 = vrot.slane %v4998_v12, %v1230_v60  ;;  %v1226_v4 = vsub.s32 6, %v4981_v3 }
 0x275   : > { %3224 = vmatprep.subr.bf16.mxu0 %v3914_v2  ;;  %3054 = vmatprep.subr.bf16.mxu1 %v3918_v6  ;;  %v5069_v2 = vrot.slane %v5015_v25, %v1230_v60 }
 0x276   : > { %6053 = vst [vmem:[#allocation13_spill] sm:$0xff] %v5063_v0  ;;  %v5075_v6 = vrot.slane %v4998_v12, %v1226_v4  ;;  %v5083_v14 = vrot.slane %v1313_v27, %v1226_v4 }
 0x277   : > { %6055 = vst [vmem:[#allocation15_spill] sm:$0xff] %v5069_v2 }
 0x278   : > { %3225 = vmatpush1.bf16.msra.mxu0 %v3917_v5  ;;  %3055 = vmatpush1.bf16.msra.mxu1 %v3922_v13  ;;  %v5072_v5 = vrot.slane %v1313_v27, %v1230_v60  ;;  %6057 = vst [vmem:[#allocation17_spill] sm:$0xff] %v5075_v6  ;;  %v5081_v13 = vrot.slane %v5015_v25, %v1226_v4  ;;  %6060 = vst [vmem:[#allocation20_spill] sm:$0xff] %v5083_v14 }
 0x279   : > { %3226 = vmatprep.subr.bf16.mxu0 %v3920_v11  ;;  %3067 = vmatprep.subr.bf16.mxu1 %v3926_v38  ;;  %v5078_v11 = vrot.slane %v5010_v20, %v1226_v4 }
 0x27a   : > { %6056 = vst [vmem:[#allocation16_spill] sm:$0xff] %v5072_v5  ;;  %6059 = vst [vmem:[#allocation19_spill] sm:$0xff] %v5081_v13 }
 0x27b   : > { %6058 = vst [vmem:[#allocation18_spill] sm:$0xff] %v5078_v11  ;;  %v5092_v11 = vsub.s32 1, %v4981_v3 }
 0x27c   : > { %3227 = vmatpush1.bf16.msra.mxu0 %v3923_v15 }
 0x27d   : > { %3239 = vmatprep.subr.bf16.mxu0 %v3929_v43  ;;  %6061 = vst [vmem:[#allocation21_spill] sm:$0xff] %v5092_v11  ;;  %v5102_v0 = vrot.slane %v4998_v12, %v5092_v11 }
 0x2ef   : > { %v1033_v15 = vpop.xlane.xlu0 %1032 }
 0x2f0   : > { %v5085_v43 = vmul.f32 0.00048828125, %v1033_v15  ;;  %v5097_v15 = vsub.s32 0, %v4981_v3 }
 0x2f2   : > { %v1122_v5 = vmul.f32 %v5085_v43, %v5085_v43  ;;  %6062 = vst [vmem:[#allocation22_spill] sm:$0xff] %v5097_v15  ;;  %v1133_v56 = vsub.f32 %v4715_v19, %v5085_v43  ;;  %v1141_v55 = vsub.f32 %v4780_v62, %v5085_v43  ;;  %v1142_v19 = vsub.f32 %v4804_v21, %v5085_v43 }
 0x2f3   : > { %v1050_v38 = vpop.xlane.xlu1 %1049 }
 0x2f4   : > { %v5087_v50 = vmul.f32 0.00048828125, %v1050_v38  ;;  %v1214_v38 = vsub.s32 3, %v4981_v3  ;;  %v5117_v3 = vrot.slane %v4998_v12, %v5097_v15 }
 0x2f6   : > { %v1123_v4 = vmul.f32 %v5087_v50, %v5087_v50  ;;  %v5137_v63 = vrot.slane %v5015_v25, %v1214_v38  ;;  %v5139_v59 = vrot.slane %v1313_v27, %v1214_v38 }
 0x2f7   : > { %v1102_v47 = vpop.xlane.xlu1 %1101 }
 0x2f8   : > { %v1120_v60 = vmul.f32 0.00048828125, %v1102_v47 }
 0x2fa   : > { %v1124_v6 = vsub.f32 %v1120_v60, %v1122_v5  ;;  %v5106_v5 = vrot.slane %v5010_v20, %v5092_v11  ;;  %v5113_v60 = vrot.slane %v1313_v27, %v5092_v11 }
 0x2fb   : > { %v1119_v2 = vpop.xlane.xlu1 %1118 }
 0x2fc   : > { %v1126_v1 = vmax.f32 %v1124_v6, 0.0  ;;  %v1121_v14 = vmul.f32 0.00048828125, %v1119_v2  ;;  %v5110_v6 = vrot.slane %v5015_v25, %v5092_v11  ;;  %v5134_v11 = vrot.slane %v5010_v20, %v1214_v38 }
 0x2fe   : > { %v1128_v13 = vadd.f32 1e-06, %v1126_v1  ;;  %v1125_v47 = vsub.f32 %v1121_v14, %v1123_v4  ;;  %v5121_v1 = vrot.slane %v5010_v20, %v5097_v15  ;;  %v5125_v14 = vrot.slane %v5015_v25, %v5097_v15 }
 0x2ff   : > { %v5128_v4 = vrot.slane %v1313_v27, %v5097_v15  ;;  %v1132_v15 = vsub.f32 %v4713_v18, %v5085_v43  ;;  %v1135_v20 = vsub.f32 %v4729_v29, %v5085_v43  ;;  %v1143_v25 = vsub.f32 %v4806_v24, %v5085_v43 }
 0x300   : > { %4212 = vrsqrt.f32 %v1128_v13  ;;  %v1127_v2 = vmax.f32 %v1125_v47, 0.0  ;;  %v5131_v13 = vrot.slane %v4998_v12, %v1214_v38  ;;  %v1140_v12 = vsub.f32 %v4778_v61, %v5085_v43 }
 0x301   : > { %v1134_v27 = vsub.f32 %v4727_v28, %v5085_v43  ;;  %v1149_v29 = vsub.f32 %v4721_v23, %v5087_v50  ;;  %v1157_v38 = vsub.f32 %v4794_v10, %v5087_v50  ;;  %v1151_v23 = vsub.f32 %v4733_v31, %v5087_v50 }
 0x302   : > { %v1129_v47 = vadd.f32 1e-06, %v1127_v2  ;;  %v1148_v2 = vsub.f32 %v4719_v22, %v5087_v50  ;;  %v1159_v24 = vsub.f32 %v4820_v46, %v5087_v50 }
 0x304   : > { %4214 = vrsqrt.f32 %v1129_v47  ;;  %v1156_v47 = vsub.f32 %v4792_v9, %v5087_v50 }
 0x30a   : > { %v5195_v61 = vpop.eup %4212 }
 0x30b   : > { %v1165_v62 = vmul.f32 %v5195_v61, %v1133_v56  ;;  %v1173_v31 = vmul.f32 %v5195_v61, %v1141_v55  ;;  %v1164_v46 = vmul.f32 %v5195_v61, %v1132_v15  ;;  %v1172_v21 = vmul.f32 %v5195_v61, %v1140_v12 }
 0x30c   : > { %v1167_v28 = vmul.f32 %v5195_v61, %v1135_v20  ;;  %v1175_v18 = vmul.f32 %v5195_v61, %v1143_v25  ;;  %v1166_v10 = vmul.f32 %v5195_v61, %v1134_v27  ;;  %v1174_v39 = vmul.f32 %v5195_v61, %v1142_v19 }
 0x30d   : > { %v1281_v22 = vmul.f32 %v5102_v0, %v1165_v62  ;;  %v1289_v9 = vmul.f32 %v5110_v6, %v1173_v31  ;;  %v1280_v56 = vmul.f32 %v5117_v3, %v1164_v46  ;;  %v1288_v55 = vmul.f32 %v5125_v14, %v1172_v21 }
 0x30e   : > { %v5217_v16 = vpop.eup %4214  ;;  %v1283_v15 = vmul.f32 %v5131_v13, %v1167_v28  ;;  %v1282_v12 = vmul.f32 %v5018_v26, %v1166_v10  ;;  %v1290_v20 = vmul.f32 %v5027_v37, %v1174_v39 }
 0x30f   : > { %v1181_v27 = vmul.f32 %v5217_v16, %v1149_v29  ;;  %v1397_v19 = vadd.f32 %v5106_v5, %v1281_v22  ;;  %v1189_v62 = vmul.f32 %v5217_v16, %v1157_v38  ;;  %v1405_v31 = vadd.f32 %v5113_v60, %v1289_v9 }
 0x310   : > { %v1180_v21 = vmul.f32 %v5217_v16, %v1148_v2  ;;  %v1396_v46 = vadd.f32 %v5121_v1, %v1280_v56  ;;  %v1188_v28 = vmul.f32 %v5217_v16, %v1156_v47  ;;  %v1404_v10 = vadd.f32 %v5128_v4, %v1288_v55 }
 0x311   : > { %v1297_v39 = vmul.f32 %v5102_v0, %v1181_v27  ;;  %v1429_v51 = vmax.f32 %v1397_v19, 0.0  ;;  %v1305_v25 = vmul.f32 %v5110_v6, %v1189_v62  ;;  %v1291_v29 = vmul.f32 %v5137_v63, %v1175_v18 }
 0x312   : > { %v1437_v22 = vmax.f32 %v1405_v31, 0.0  ;;  %v1296_v38 = vmul.f32 %v5117_v3, %v1180_v21  ;;  %v1428_v41 = vmax.f32 %v1396_v46, 0.0  ;;  %v1304_v9 = vmul.f32 %v5125_v14, %v1188_v28 }
 0x313   : > { %v1413_v2 = vadd.f32 %v5106_v5, %v1297_v39  ;;  %v1421_v56 = vadd.f32 %v5113_v60, %v1305_v25  ;;  %v1183_v47 = vmul.f32 %v5217_v16, %v1151_v23  ;;  %v1399_v55 = vadd.f32 %v5134_v11, %v1283_v15 }
 0x314   : > { %v1412_v0 = vadd.f32 %v5121_v1, %v1296_v38  ;;  %v1420_v6 = vadd.f32 %v5128_v4, %v1304_v9  ;;  %v1436_v27 = vmax.f32 %v1404_v10, 0.0  ;;  %v1191_v18 = vmul.f32 %v5217_v16, %v1159_v24  ;;  %v3924_v1 = vld [vmem:[%s6022_s3 + $0x100] ss:$8 sps:$4 sm:$0xff]   ;;  %v3935_v10 = vld [vmem:[%s6022_s3 + $0x514] ss:$8 sps:$4 sm:$0xff]  }
 0x315   : > { %v1445_v19 = vmax.f32 %v1413_v2, 0.0  ;;  %v1453_v3 = vmax.f32 %v1421_v56, 0.0  ;;  %v1299_v62 = vmul.f32 %v5131_v13, %v1183_v47  ;;  %v1407_v14 = vadd.f32 %v5139_v59, %v1291_v29  ;;  %v3927_v24 = vld [vmem:[%s6022_s3 + $0x500] ss:$8 sps:$4 sm:$0xff]   ;;  %v3933_v56 = vld [vmem:[%s6022_s3 + $0x510] ss:$8 sps:$4 sm:$0xff]  }
 0x316   : > { %v1444_v5 = vmax.f32 %v1412_v0, 0.0  ;;  %v1452_v31 = vmax.f32 %v1420_v6, 0.0  ;;  %v1431_v60 = vmax.f32 %v1399_v55, 0.0  ;;  %v1307_v23 = vmul.f32 %v5137_v63, %v1191_v18  ;;  %v3932_v63 = vld [vmem:[%s6022_s3 + $0x114] ss:$8 sps:$4 sm:$0xff]  }
 0x317   : > { %v1461_v25 = vpack.c.bf16 %v1445_v19, %v1429_v51  ;;  %v1469_v4 = vpack.c.bf16 %v1453_v3, %v1437_v22  ;;  %v1415_v15 = vadd.f32 %v5134_v11, %v1299_v62  ;;  %v6063_v13 = vsub.f32 %v4731_v30, %v5087_v50  ;;  %v3941_v6 = vld [vmem:[%s6022_s3 + $0x524] ss:$8 sps:$4 sm:$0xff]  }
 0x318   : > { %v1460_v46 = vpack.c.bf16 %v1444_v5, %v1428_v41  ;;  %v1468_v28 = vpack.c.bf16 %v1452_v31, %v1436_v27  ;;  %v1423_v51 = vadd.f32 %v5139_v59, %v1307_v23  ;;  %v1398_v39 = vadd.f32 %v5024_v36, %v1282_v12 }
 0x319   : > { %v1182_v21 = vmul.f32 %v5217_v16, %v6063_v13  ;;  %3056 = vmatprep.mubr.bf16.mxu1 %v1461_v25  ;;  %3228 = vmatprep.mubr.bf16.mxu0 %v1469_v4  ;;  %v1447_v11 = vmax.f32 %v1415_v15, 0.0  ;;  %v6064_v41 = vsub.f32 %v4818_v45, %v5087_v50  ;;  %v1406_v29 = vadd.f32 %v5035_v44, %v1290_v20  ;;  %v3930_v20 = vld [vmem:[%s6022_s3 + $0x110] ss:$8 sps:$4 sm:$0xff]  }
 0x31a   : > { %3057 = vmatmul.mubr.bf16.vlgmr.msra.gmra.mrb[0].mxu1 %v1460_v46  ;;  %3229 = vmatmul.mubr.bf16.vlgmr.msra.gmra.mrb[0].mxu0 %v1468_v28  ;;  %v1439_v22 = vmax.f32 %v1407_v14, 0.0  ;;  %v1455_v38 = vmax.f32 %v1423_v51, 0.0  ;;  %v6065_v9 = vsub.f32 %v4737_v33, %v5085_v43  ;;  %v6066_v2 = vsub.f32 %v4741_v35, %v5087_v50  ;;  %v3938_v35 = vld [vmem:[%s6022_s3 + $0x124] ss:$8 sps:$4 sm:$0xff]  }
 0x31b   : > { %v1298_v30 = vmul.f32 %v5018_v26, %v1182_v21  ;;  %v1190_v59 = vmul.f32 %v5217_v16, %v6064_v41  ;;  %3068 = vmatpush1.bf16.msra.mxu1 %v3924_v1  ;;  %3240 = vmatpush1.bf16.msra.mxu0 %v3927_v24  ;;  %v1463_v45 = vpack.c.bf16 %v1447_v11, %v1431_v60  ;;  %v1430_v47 = vmax.f32 %v1398_v39, 0.0  ;;  %v3947_v24 = vld [vmem:[%s6022_s3 + $0x534] ss:$8 sps:$4 sm:$0xff]   ;;  %v6071_v51 = vld [vmem:[#allocation9_spill] sm:$0xff] }
 0x31c   : > { %v1169_v12 = vmul.f32 %v5195_v61, %v6065_v9  ;;  %v1185_v26 = vmul.f32 %v5217_v16, %v6066_v2  ;;  %v1471_v0 = vpack.c.bf16 %v1455_v38, %v1439_v22  ;;  %3069 = vmatprep.subr.bf16.mxu1 %v3932_v63  ;;  %3241 = vmatprep.subr.bf16.mxu0 %v3935_v10  ;;  %v1438_v27 = vmax.f32 %v1406_v29, 0.0  ;;  %v3942_v22 = vld [vmem:[%s6022_s3 + $0x130] ss:$8 sps:$4 sm:$0xff]  }
 0x31d   : > { %v1414_v33 = vadd.f32 %v5024_v36, %v1298_v30  ;;  %v1306_v55 = vmul.f32 %v5027_v37, %v1190_v59  ;;  %3099 = vmatprep.mubr.bf16.mxu1 %v1463_v45  ;;  %v6067_v3 = vsub.f32 %v4832_v58, %v5085_v43  ;;  %v6068_v14 = vsub.f32 %v4846_v8, %v5087_v50  ;;  %v3936_v8 = vld [vmem:[%s6022_s3 + $0x120] ss:$8 sps:$4 sm:$0xff]   ;;  %v3950_v45 = vld [vmem:[%s6022_s3 + $0x144] ss:$8 sps:$4 sm:$0xff]  }
 0x31e   : > { %v1285_v18 = vmul.f32 %v5039_v48, %v1169_v12  ;;  %v1301_v19 = vmul.f32 %v5039_v48, %v1185_v26  ;;  %3271 = vmatprep.mubr.bf16.mxu0 %v1471_v0  ;;  %v6069_v48 = vsub.f32 %v4735_v32, %v5085_v43  ;;  %v6070_v58 = vsub.f32 %v4739_v34, %v5087_v50  ;;  %v3944_v34 = vld [vmem:[%s6022_s3 + $0x134] ss:$8 sps:$4 sm:$0xff]   ;;  %v6073_v30 = vld [vmem:[#allocation10_spill] sm:$0xff] }
 0x31f   : > { %v1446_v36 = vmax.f32 %v1414_v33, 0.0  ;;  %v1422_v37 = vadd.f32 %v5035_v44, %v1306_v55  ;;  %v1177_v62 = vmul.f32 %v5195_v61, %v6067_v3  ;;  %v1193_v5 = vmul.f32 %v5217_v16, %v6068_v14  ;;  %3070 = vmatpush1.bf16.msra.mxu1 %v3930_v20  ;;  %3242 = vmatpush1.bf16.msra.mxu0 %v3933_v56  ;;  %v6075_v12 = vld [vmem:[#allocation11_spill] sm:$0xff]  ;;  %v3953_v20 = vld [vmem:[%s6022_s3 + $0x544] ss:$8 sps:$4 sm:$0xff]  }
 0x320   : > { %v1401_v31 = vadd.f32 %v5042_v49, %v1285_v18  ;;  %v1417_v60 = vadd.f32 %v5042_v49, %v1301_v19  ;;  %v1168_v44 = vmul.f32 %v5195_v61, %v6069_v48  ;;  %v1184_v23 = vmul.f32 %v5217_v16, %v6070_v58  ;;  %v3939_v49 = vld [vmem:[%s6022_s3 + $0x520] ss:$8 sps:$4 sm:$0xff]   ;;  %3071 = vmatprep.subr.bf16.mxu1 %v3938_v35  ;;  %v6078_v35 = vld [vmem:[#allocation12_spill] sm:$0xff] }
 0x321   : > { %v5321_v25 = vpack.c.bf16 %v1446_v36, %v1430_v47  ;;  %v1454_v32 = vmax.f32 %v1422_v37, 0.0  ;;  %v1293_v1 = vmul.f32 %v5046_v53, %v1177_v62  ;;  %v1309_v4 = vmul.f32 %v5046_v53, %v1193_v5  ;;  %3243 = vmatprep.subr.bf16.mxu0 %v3941_v6  ;;  %v3948_v5 = vld [vmem:[%s6022_s3 + $0x140] ss:$8 sps:$4 sm:$0xff]  }
 0x322   : > { %v1433_v15 = vmax.f32 %v1401_v31, 0.0  ;;  %v1449_v13 = vmax.f32 %v1417_v60, 0.0  ;;  %v1284_v21 = vmul.f32 %v5049_v54, %v1168_v44  ;;  %v1300_v46 = vmul.f32 %v5049_v54, %v1184_v23  ;;  %v6082_v60 = vld [vmem:[#allocation14_spill] sm:$0xff]  ;;  %v6083_v44 = vld [vmem:[#allocation15_spill] sm:$0xff]  ;;  %v6084_v23 = vld [vmem:[#allocation5_spill] sm:$0xff] }
 0x323   : > { %v5333_v28 = vpack.c.bf16 %v1454_v32, %v1438_v27  ;;  %v1409_v53 = vadd.f32 %v6071_v51, %v1293_v1  ;;  %v1425_v63 = vadd.f32 %v6071_v51, %v1309_v4  ;;  %v6072_v10 = vsub.f32 %v4830_v57, %v5085_v43  ;;  %3072 = vmatpush1.bf16.msra.mxu1 %v3936_v8  ;;  %v3945_v57 = vld [vmem:[%s6022_s3 + $0x530] ss:$8 sps:$4 sm:$0xff]   ;;  %v6079_v27 = vld [vmem:[#allocation13_spill] sm:$0xff]  ;;  %v3959_v32 = vld [vmem:[%s6022_s3 + $0x554] ss:$8 sps:$4 sm:$0xff]  }
 0x324   : > { %v5341_v11 = vpack.c.bf16 %v1449_v13, %v1433_v15  ;;  %v1400_v41 = vadd.f32 %v6073_v30, %v1284_v21  ;;  %v1416_v59 = vadd.f32 %v6073_v30, %v1300_v46  ;;  %v6074_v54 = vsub.f32 %v4844_v7, %v5087_v50  ;;  %3244 = vmatpush1.bf16.msra.mxu0 %v3939_v49  ;;  %v3956_v49 = vld [vmem:[%s6022_s3 + $0x154] ss:$8 sps:$4 sm:$0xff]  }
 0x325   : > { %v1176_v39 = vmul.f32 %v5195_v61, %v6072_v10  ;;  %v1441_v38 = vmax.f32 %v1409_v53, 0.0  ;;  %v1457_v9 = vmax.f32 %v1425_v63, 0.0  ;;  %v6076_v26 = vsub.f32 %v4751_v40, %v5085_v43  ;;  %3073 = vmatprep.subr.bf16.mxu1 %v3944_v34  ;;  %3245 = vmatprep.subr.bf16.mxu0 %v3947_v24  ;;  %v6086_v24 = vld [vmem:[#allocation6_spill] sm:$0xff]  ;;  %v6088_v46 = vld [vmem:[#allocation16_spill] sm:$0xff]  ;;  %v6089_v53 = vld [vmem:[#allocation17_spill] sm:$0xff] }
 0x326   : > { %v1192_v29 = vmul.f32 %v5217_v16, %v6074_v54  ;;  %v1432_v56 = vmax.f32 %v1400_v41, 0.0  ;;  %v1448_v33 = vmax.f32 %v1416_v59, 0.0  ;;  %v6077_v55 = vsub.f32 %v4768_v52, %v5087_v50  ;;  %v6090_v10 = vld [vmem:[#allocation7_spill] sm:$0xff] }
 0x327   : > { %v1292_v2 = vmul.f32 %v6075_v12, %v1176_v39  ;;  %v1171_v7 = vmul.f32 %v5195_v61, %v6076_v26  ;;  %v5371_v0 = vpack.c.bf16 %v1457_v9, %v1441_v38  ;;  %v6080_v19 = vsub.f32 %v4854_v17, %v5085_v43  ;;  %3074 = vmatpush1.bf16.msra.mxu1 %v3942_v22  ;;  %v3951_v17 = vld [vmem:[%s6022_s3 + $0x540] ss:$8 sps:$4 sm:$0xff]   ;;  %v3954_v22 = vld [vmem:[%s6022_s3 + $0x150] ss:$8 sps:$4 sm:$0xff]  }
 0x328   : > { %v1308_v47 = vmul.f32 %v6075_v12, %v1192_v29  ;;  %v1187_v40 = vmul.f32 %v5217_v16, %v6077_v55  ;;  %v5379_v37 = vpack.c.bf16 %v1448_v33, %v1432_v56  ;;  %v6081_v52 = vsub.f32 %v4867_v42, %v5087_v50  ;;  %3246 = vmatpush1.bf16.msra.mxu0 %v3945_v57  ;;  %v3957_v57 = vld [vmem:[%s6022_s3 + $0x550] ss:$8 sps:$4 sm:$0xff]  }
 0x329   : > { %v1408_v6 = vadd.f32 %v6078_v35, %v1292_v2  ;;  %v1287_v18 = vmul.f32 %v6079_v27, %v1171_v7  ;;  %v1179_v36 = vmul.f32 %v5195_v61, %v6080_v19  ;;  %v6085_v42 = vsub.f32 %v6084_v23, %v5085_v43  ;;  %3075 = vmatprep.subr.bf16.mxu1 %v3950_v45  ;;  %v6095_v2 = vld [vmem:[#allocation19_spill] sm:$0xff]  ;;  %v3962_v7 = vld [vmem:[%s6022_s3 + $0x164] ss:$8 sps:$4 sm:$0xff]  }
 0x32a   : > { %v1424_v3 = vadd.f32 %v6078_v35, %v1308_v47  ;;  %v1303_v62 = vmul.f32 %v6079_v27, %v1187_v40  ;;  %v1195_v14 = vmul.f32 %v5217_v16, %v6081_v52  ;;  %3247 = vmatprep.subr.bf16.mxu0 %v3953_v20  ;;  %v6087_v15 = vsub.f32 %v6086_v24, %v5087_v50  ;;  %v3965_v45 = vld [vmem:[%s6022_s3 + $0x564] ss:$8 sps:$4 sm:$0xff]   ;;  %v6096_v47 = vld [vmem:[#allocation20_spill] sm:$0xff]  ;;  %v3960_v27 = vld [vmem:[%s6022_s3 + $0x160] ss:$8 sps:$4 sm:$0xff]  }
 0x32b   : > { %v1440_v31 = vmax.f32 %v1408_v6, 0.0  ;;  %v1403_v48 = vadd.f32 %v6082_v60, %v1287_v18  ;;  %v1295_v58 = vmul.f32 %v6083_v44, %v1179_v36  ;;  %v1170_v8 = vmul.f32 %v5195_v61, %v6085_v42  ;;  %3076 = vmatpush1.bf16.msra.mxu1 %v3948_v5  ;;  %v3963_v18 = vld [vmem:[%s6022_s3 + $0x560] ss:$8 sps:$4 sm:$0xff]   ;;  %v3968_v36 = vld [vmem:[%s6022_s3 + $0x174] ss:$8 sps:$4 sm:$0xff]  }
 0x32c   : > { %v1456_v1 = vmax.f32 %v1424_v3, 0.0  ;;  %v1419_v4 = vadd.f32 %v6082_v60, %v1303_v62  ;;  %v1311_v34 = vmul.f32 %v6083_v44, %v1195_v14  ;;  %v1186_v13 = vmul.f32 %v5217_v16, %v6087_v15  ;;  %3248 = vmatpush1.bf16.msra.mxu0 %v3951_v17  ;;  %3077 = vmatprep.subr.bf16.mxu1 %v3956_v49  ;;  %v3971_v3 = vld [vmem:[%s6022_s3 + $0x574] ss:$8 sps:$4 sm:$0xff]   ;;  %v3966_v5 = vld [vmem:[%s6022_s3 + $0x170] ss:$8 sps:$4 sm:$0xff]  }
 0x32d   : > { %v1435_v21 = vmax.f32 %v1403_v48, 0.0  ;;  %v1411_v51 = vadd.f32 %v6088_v46, %v1295_v58  ;;  %v1286_v63 = vmul.f32 %v6089_v53, %v1170_v8  ;;  %v6091_v39 = vsub.f32 %v6090_v10, %v5085_v43  ;;  %v6092_v43 = vld [vmem:[#allocation18_spill] sm:$0xff]  ;;  %3249 = vmatprep.subr.bf16.mxu0 %v3959_v32  ;;  %v3969_v17 = vld [vmem:[%s6022_s3 + $0x570] ss:$8 sps:$4 sm:$0xff]   ;;  %v3980_v23 = vld [vmem:[%s6022_s3 + $0x194] ss:$8 sps:$4 sm:$0xff]  }
 0x32e   : > { %v5417_v41 = vpack.c.bf16 %v1456_v1, %v1440_v31  ;;  %v1451_v59 = vmax.f32 %v1419_v4, 0.0  ;;  %v1427_v54 = vadd.f32 %v6088_v46, %v1311_v34  ;;  %v1302_v29 = vmul.f32 %v6089_v53, %v1186_v13  ;;  %v3974_v60 = vld [vmem:[%s6022_s3 + $0x184] ss:$8 sps:$4 sm:$0xff]   ;;  %v3972_v44 = vld [vmem:[%s6022_s3 + $0x180] ss:$8 sps:$4 sm:$0xff]  }
 0x32f   : > { %v1178_v30 = vmul.f32 %v5195_v61, %v6091_v39  ;;  %v1402_v38 = vadd.f32 %v6092_v43, %v1286_v63  ;;  %v6093_v61 = vld [vmem:[#allocation8_spill] sm:$0xff]  ;;  %v1443_v56 = vmax.f32 %v1411_v51, 0.0  ;;  %3078 = vmatpush1.bf16.msra.mxu1 %v3954_v22  ;;  %v3977_v48 = vld [vmem:[%s6022_s3 + $0x584] ss:$8 sps:$4 sm:$0xff]   ;;  %v3975_v58 = vld [vmem:[%s6022_s3 + $0x580] ss:$8 sps:$4 sm:$0xff]  }
 0x330   : > { %v6094_v9 = vsub.f32 %v6093_v61, %v5087_v50  ;;  %v5439_v20 = vpack.c.bf16 %v1451_v59, %v1435_v21  ;;  %v1459_v33 = vmax.f32 %v1427_v54, 0.0  ;;  %v1418_v50 = vadd.f32 %v6092_v43, %v1302_v29  ;;  %3250 = vmatpush1.bf16.msra.mxu0 %v3957_v57  ;;  %3079 = vmatprep.subr.bf16.mxu1 %v3962_v7  ;;  %v3983_v42 = vld [vmem:[%s6022_s3 + $0x594] ss:$8 sps:$4 sm:$0xff]   ;;  %v3978_v8 = vld [vmem:[%s6022_s3 + $0x190] ss:$8 sps:$4 sm:$0xff]  }
 0x331   : > { %v1294_v26 = vmul.f32 %v6095_v2, %v1178_v30  ;;  %v1434_v35 = vmax.f32 %v1402_v38, 0.0  ;;  %3251 = vmatprep.subr.bf16.mxu0 %v3965_v45  ;;  %v3981_v49 = vld [vmem:[%s6022_s3 + $0x590] ss:$8 sps:$4 sm:$0xff]   ;;  %v3986_v32 = vld [vmem:[%s6022_s3 + $0x1a4] ss:$8 sps:$4 sm:$0xff]  }
 0x332   : > { %v1194_v12 = vmul.f32 %v5217_v16, %v6094_v9  ;;  %v5444_v40 = vpack.c.bf16 %v1459_v33, %v1443_v56  ;;  %v1450_v6 = vmax.f32 %v1418_v50, 0.0  ;;  %v3989_v1 = vld [vmem:[%s6022_s3 + $0x5a4] ss:$8 sps:$4 sm:$0xff]   ;;  %v3984_v4 = vld [vmem:[%s6022_s3 + $0x1a0] ss:$8 sps:$4 sm:$0xff]  }
 0x333   : > { %v1410_v55 = vadd.f32 %v6096_v47, %v1294_v26  ;;  %3080 = vmatpush1.bf16.msra.mxu1 %v3960_v27  ;;  %v3987_v34 = vld [vmem:[%s6022_s3 + $0x5a0] ss:$8 sps:$4 sm:$0xff]   ;;  %v3992_v24 = vld [vmem:[%s6022_s3 + $0x1b4] ss:$8 sps:$4 sm:$0xff]   ;;  %v3990_v13 = vld [vmem:[%s6022_s3 + $0x1b0] ss:$8 sps:$4 sm:$0xff]  }
 0x334   : > { %v1310_v16 = vmul.f32 %v6095_v2, %v1194_v12  ;;  %v5459_v62 = vpack.c.bf16 %v1450_v6, %v1434_v35  ;;  %3252 = vmatpush1.bf16.msra.mxu0 %v3963_v18  ;;  %3081 = vmatprep.subr.bf16.mxu1 %v3968_v36  ;;  %v3995_v15 = vld [vmem:[%s6022_s3 + $0x5b4] ss:$8 sps:$4 sm:$0xff]   ;;  %v3993_v21 = vld [vmem:[%s6022_s3 + $0x5b0] ss:$8 sps:$4 sm:$0xff]   ;;  %v3998_v46 = vld [vmem:[%s6022_s3 + $0x1c4] ss:$8 sps:$4 sm:$0xff]  }
 0x335   : > { %v1442_v52 = vmax.f32 %v1410_v55, 0.0  ;;  %3253 = vmatprep.subr.bf16.mxu0 %v3971_v3  ;;  %v4001_v51 = vld [vmem:[%s6022_s3 + $0x5c4] ss:$8 sps:$4 sm:$0xff]   ;;  %v3996_v53 = vld [vmem:[%s6022_s3 + $0x1c0] ss:$8 sps:$4 sm:$0xff]  }
 0x336   : > { %v1426_v19 = vadd.f32 %v6096_v47, %v1310_v16  ;;  %v3999_v63 = vld [vmem:[%s6022_s3 + $0x5c0] ss:$8 sps:$4 sm:$0xff]   ;;  %v4004_v10 = vld [vmem:[%s6022_s3 + $0x1d4] ss:$8 sps:$4 sm:$0xff]   ;;  %v4002_v30 = vld [vmem:[%s6022_s3 + $0x1d0] ss:$8 sps:$4 sm:$0xff]  }
 0x337   : > { %3082 = vmatpush1.bf16.msra.mxu1 %v3966_v5  ;;  %v4007_v39 = vld [vmem:[%s6022_s3 + $0x5d4] ss:$8 sps:$4 sm:$0xff]   ;;  %v4005_v59 = vld [vmem:[%s6022_s3 + $0x5d0] ss:$8 sps:$4 sm:$0xff]   ;;  %v4010_v54 = vld [vmem:[%s6022_s3 + $0x1e4] ss:$8 sps:$4 sm:$0xff]  }
 0x338   : > { %v1458_v14 = vmax.f32 %v1426_v19, 0.0  ;;  %3254 = vmatpush1.bf16.msra.mxu0 %v3969_v17  ;;  %3083 = vmatprep.subr.bf16.mxu1 %v3974_v60  ;;  %v4013_v29 = vld [vmem:[%s6022_s3 + $0x5e4] ss:$8 sps:$4 sm:$0xff]   ;;  %v4008_v22 = vld [vmem:[%s6022_s3 + $0x1e0] ss:$8 sps:$4 sm:$0xff]  }
 0x339   : > { %3255 = vmatprep.subr.bf16.mxu0 %v3977_v48  ;;  %v4011_v57 = vld [vmem:[%s6022_s3 + $0x5e0] ss:$8 sps:$4 sm:$0xff]   ;;  %v4016_v43 = vld [vmem:[%s6022_s3 + $0x1f4] ss:$8 sps:$4 sm:$0xff]   ;;  %v4014_v61 = vld [vmem:[%s6022_s3 + $0x1f0] ss:$8 sps:$4 sm:$0xff]  }
 0x33a   : > { %v5467_v31 = vpack.c.bf16 %v1458_v14, %v1442_v52  ;;  %v4019_v38 = vld [vmem:[%s6022_s3 + $0x5f4] ss:$8 sps:$4 sm:$0xff]   ;;  %v4017_v9 = vld [vmem:[%s6022_s3 + $0x5f0] ss:$8 sps:$4 sm:$0xff]   ;;  %v4022_v12 = vld [vmem:[%s6022_s3 + $0x204] ss:$8 sps:$4 sm:$0xff]  }
 0x33b   : > { %3084 = vmatpush1.bf16.msra.mxu1 %v3972_v44  ;;  %v4025_v2 = vld [vmem:[%s6022_s3 + $0x604] ss:$8 sps:$4 sm:$0xff]   ;;  %v4020_v26 = vld [vmem:[%s6022_s3 + $0x200] ss:$8 sps:$4 sm:$0xff]   ;;  %v4028_v45 = vld [vmem:[%s6022_s3 + $0x214] ss:$8 sps:$4 sm:$0xff]  }
 0x33c   : > { %3256 = vmatpush1.bf16.msra.mxu0 %v3975_v58  ;;  %3085 = vmatprep.subr.bf16.mxu1 %v3980_v23  ;;  %v4023_v7 = vld [vmem:[%s6022_s3 + $0x600] ss:$8 sps:$4 sm:$0xff]   ;;  %v4031_v56 = vld [vmem:[%s6022_s3 + $0x614] ss:$8 sps:$4 sm:$0xff]   ;;  %v4026_v33 = vld [vmem:[%s6022_s3 + $0x210] ss:$8 sps:$4 sm:$0xff]  }
 0x33d   : > { %3257 = vmatprep.subr.bf16.mxu0 %v3983_v42  ;;  %v4029_v50 = vld [vmem:[%s6022_s3 + $0x610] ss:$8 sps:$4 sm:$0xff]   ;;  %v4040_v16 = vld [vmem:[%s6022_s3 + $0x234] ss:$8 sps:$4 sm:$0xff]   ;;  %v4046_v6 = vld [vmem:[%s6022_s3 + $0x244] ss:$8 sps:$4 sm:$0xff]  }
 0x33e   : > { %v4043_v47 = vld [vmem:[%s6022_s3 + $0x634] ss:$8 sps:$4 sm:$0xff]   ;;  %v4038_v55 = vld [vmem:[%s6022_s3 + $0x230] ss:$8 sps:$4 sm:$0xff]   ;;  %v4049_v27 = vld [vmem:[%s6022_s3 + $0x644] ss:$8 sps:$4 sm:$0xff]  }
 0x33f   : > { %3086 = vmatpush1.bf16.msra.mxu1 %v3978_v8  ;;  %v4041_v35 = vld [vmem:[%s6022_s3 + $0x630] ss:$8 sps:$4 sm:$0xff]   ;;  %v4044_v18 = vld [vmem:[%s6022_s3 + $0x240] ss:$8 sps:$4 sm:$0xff]   ;;  %v4052_v36 = vld [vmem:[%s6022_s3 + $0x254] ss:$8 sps:$4 sm:$0xff]  }
 0x340   : > { %3258 = vmatpush1.bf16.msra.mxu0 %v3981_v49  ;;  %3087 = vmatprep.subr.bf16.mxu1 %v3986_v32  ;;  %v4047_v19 = vld [vmem:[%s6022_s3 + $0x640] ss:$8 sps:$4 sm:$0xff]   ;;  %v4055_v3 = vld [vmem:[%s6022_s3 + $0x654] ss:$8 sps:$4 sm:$0xff]   ;;  %v4050_v52 = vld [vmem:[%s6022_s3 + $0x250] ss:$8 sps:$4 sm:$0xff]  }
 0x341   : > { %3259 = vmatprep.subr.bf16.mxu0 %v3989_v1  ;;  %v4053_v14 = vld [vmem:[%s6022_s3 + $0x650] ss:$8 sps:$4 sm:$0xff]   ;;  %v4058_v5 = vld [vmem:[%s6022_s3 + $0x264] ss:$8 sps:$4 sm:$0xff]   ;;  %v4056_v60 = vld [vmem:[%s6022_s3 + $0x260] ss:$8 sps:$4 sm:$0xff]  }
 0x342   : > { %v4061_v17 = vld [vmem:[%s6022_s3 + $0x664] ss:$8 sps:$4 sm:$0xff]   ;;  %v4059_v48 = vld [vmem:[%s6022_s3 + $0x660] ss:$8 sps:$4 sm:$0xff]   ;;  %v4064_v44 = vld [vmem:[%s6022_s3 + $0x274] ss:$8 sps:$4 sm:$0xff]  }
 0x343   : > { %3088 = vmatpush1.bf16.msra.mxu1 %v3984_v4  ;;  %v4067_v58 = vld [vmem:[%s6022_s3 + $0x674] ss:$8 sps:$4 sm:$0xff]   ;;  %v4062_v23 = vld [vmem:[%s6022_s3 + $0x270] ss:$8 sps:$4 sm:$0xff]   ;;  %v4070_v8 = vld [vmem:[%s6022_s3 + $0x284] ss:$8 sps:$4 sm:$0xff]  }
 0x344   : > { %3260 = vmatpush1.bf16.msra.mxu0 %v3987_v34  ;;  %3089 = vmatprep.subr.bf16.mxu1 %v3992_v24  ;;  %v4065_v42 = vld [vmem:[%s6022_s3 + $0x670] ss:$8 sps:$4 sm:$0xff]   ;;  %v4073_v49 = vld [vmem:[%s6022_s3 + $0x684] ss:$8 sps:$4 sm:$0xff]   ;;  %v4068_v32 = vld [vmem:[%s6022_s3 + $0x280] ss:$8 sps:$4 sm:$0xff]  }
 0x345   : > { %3261 = vmatprep.subr.bf16.mxu0 %v3995_v15  ;;  %v4071_v1 = vld [vmem:[%s6022_s3 + $0x680] ss:$8 sps:$4 sm:$0xff]   ;;  %v4076_v4 = vld [vmem:[%s6022_s3 + $0x294] ss:$8 sps:$4 sm:$0xff]   ;;  %v4074_v24 = vld [vmem:[%s6022_s3 + $0x290] ss:$8 sps:$4 sm:$0xff]  }
 0x346   : > { %v4079_v34 = vld [vmem:[%s6022_s3 + $0x694] ss:$8 sps:$4 sm:$0xff]   ;;  %v4077_v15 = vld [vmem:[%s6022_s3 + $0x690] ss:$8 sps:$4 sm:$0xff]  }
 0x347   : > { %3090 = vmatpush1.bf16.msra.mxu1 %v3990_v13  ;;  %v4082_v13 = vld [vmem:[%s6022_s3 + $0x2a4] ss:$8 sps:$4 sm:$0xff]  }
 0x348   : > { %3262 = vmatpush1.bf16.msra.mxu0 %v3993_v21  ;;  %3091 = vmatprep.subr.bf16.mxu1 %v3998_v46  ;;  %v4085_v21 = vld [vmem:[%s6022_s3 + $0x6a4] ss:$8 sps:$4 sm:$0xff]   ;;  %v4080_v46 = vld [vmem:[%s6022_s3 + $0x2a0] ss:$8 sps:$4 sm:$0xff]  }
 0x349   : > { %3263 = vmatprep.subr.bf16.mxu0 %v4001_v51  ;;  %v4083_v51 = vld [vmem:[%s6022_s3 + $0x6a0] ss:$8 sps:$4 sm:$0xff]  }
 0x34b   : > { %3092 = vmatpush1.bf16.msra.mxu1 %v3996_v53  ;;  %v4088_v53 = vld [vmem:[%s6022_s3 + $0x2b4] ss:$8 sps:$4 sm:$0xff]  }
 0x34c   : > { %3264 = vmatpush1.bf16.msra.mxu0 %v3999_v63  ;;  %3093 = vmatprep.subr.bf16.mxu1 %v4004_v10  ;;  %v4091_v63 = vld [vmem:[%s6022_s3 + $0x6b4] ss:$8 sps:$4 sm:$0xff]   ;;  %v4086_v10 = vld [vmem:[%s6022_s3 + $0x2b0] ss:$8 sps:$4 sm:$0xff]  }
 0x34d   : > { %3265 = vmatprep.subr.bf16.mxu0 %v4007_v39  ;;  %v4089_v39 = vld [vmem:[%s6022_s3 + $0x6b0] ss:$8 sps:$4 sm:$0xff]  }
 0x34f   : > { %3094 = vmatpush1.bf16.msra.mxu1 %v4002_v30  ;;  %v4094_v30 = vld [vmem:[%s6022_s3 + $0x2c4] ss:$8 sps:$4 sm:$0xff]  }
 0x350   : > { %3266 = vmatpush1.bf16.msra.mxu0 %v4005_v59  ;;  %3095 = vmatprep.subr.bf16.mxu1 %v4010_v54  ;;  %v4097_v59 = vld [vmem:[%s6022_s3 + $0x6c4] ss:$8 sps:$4 sm:$0xff]   ;;  %v4092_v54 = vld [vmem:[%s6022_s3 + $0x2c0] ss:$8 sps:$4 sm:$0xff]  }
 0x351   : > { %3267 = vmatprep.subr.bf16.mxu0 %v4013_v29  ;;  %v4095_v29 = vld [vmem:[%s6022_s3 + $0x6c0] ss:$8 sps:$4 sm:$0xff]  }
 0x353   : > { %3096 = vmatpush1.bf16.msra.mxu1 %v4008_v22  ;;  %v4100_v22 = vld [vmem:[%s6022_s3 + $0x2d4] ss:$8 sps:$4 sm:$0xff]  }
 0x354   : > { %3268 = vmatpush1.bf16.msra.mxu0 %v4011_v57  ;;  %3097 = vmatprep.subr.bf16.mxu1 %v4016_v43  ;;  %v4103_v57 = vld [vmem:[%s6022_s3 + $0x6d4] ss:$8 sps:$4 sm:$0xff]   ;;  %v4098_v43 = vld [vmem:[%s6022_s3 + $0x2d0] ss:$8 sps:$4 sm:$0xff]  }
 0x355   : > { %3269 = vmatprep.subr.bf16.mxu0 %v4019_v38  ;;  %v4101_v38 = vld [vmem:[%s6022_s3 + $0x6d0] ss:$8 sps:$4 sm:$0xff]  }
 0x357   : > { %3098 = vmatpush1.bf16.msra.mxu1 %v4014_v61  ;;  %v4106_v61 = vld [vmem:[%s6022_s3 + $0x2e4] ss:$8 sps:$4 sm:$0xff]  }
 0x358   : > { %3270 = vmatpush1.bf16.msra.mxu0 %v4017_v9  ;;  %3110 = vmatprep.subr.bf16.mxu1 %v4022_v12  ;;  %v4109_v9 = vld [vmem:[%s6022_s3 + $0x6e4] ss:$8 sps:$4 sm:$0xff]   ;;  %v4104_v12 = vld [vmem:[%s6022_s3 + $0x2e0] ss:$8 sps:$4 sm:$0xff]  }
 0x359   : > { %3282 = vmatprep.subr.bf16.mxu0 %v4025_v2  ;;  %v4107_v2 = vld [vmem:[%s6022_s3 + $0x6e0] ss:$8 sps:$4 sm:$0xff]  }
 0x35a   : > { %3100 = vmatmul.mubr.bf16.vlgmr.msra.gmra.mrb[0].mxu1 %v5321_v25  ;;  %v4034_v25 = vld [vmem:[%s6022_s3 + $0x224] ss:$8 sps:$4 sm:$0xff]  }
 0x35b   : > { %3272 = vmatmul.mubr.bf16.vlgmr.msra.gmra.mrb[0].mxu0 %v5333_v28  ;;  %3111 = vmatpush1.bf16.msra.mxu1 %v4020_v26  ;;  %v4037_v28 = vld [vmem:[%s6022_s3 + $0x624] ss:$8 sps:$4 sm:$0xff]   ;;  %v4112_v26 = vld [vmem:[%s6022_s3 + $0x2f4] ss:$8 sps:$4 sm:$0xff]  }
 0x35c   : > { %3142 = vmatprep.mubr.bf16.mxu1 %v5341_v11  ;;  %3283 = vmatpush1.bf16.msra.mxu0 %v4023_v7  ;;  %v4032_v11 = vld [vmem:[%s6022_s3 + $0x220] ss:$8 sps:$4 sm:$0xff]   ;;  %v4115_v7 = vld [vmem:[%s6022_s3 + $0x6f4] ss:$8 sps:$4 sm:$0xff]  }
 0x35d   : > { %3314 = vmatprep.mubr.bf16.mxu0 %v5371_v0  ;;  %3112 = vmatprep.subr.bf16.mxu1 %v4028_v45  ;;  %v4035_v0 = vld [vmem:[%s6022_s3 + $0x620] ss:$8 sps:$4 sm:$0xff]   ;;  %v4110_v45 = vld [vmem:[%s6022_s3 + $0x2f0] ss:$8 sps:$4 sm:$0xff]  }
 0x35e   : > { %3284 = vmatprep.subr.bf16.mxu0 %v4031_v56  ;;  %v4113_v56 = vld [vmem:[%s6022_s3 + $0x6f0] ss:$8 sps:$4 sm:$0xff]  }
 0x35f   : > { %3113 = vmatpush1.bf16.msra.mxu1 %v4026_v33  ;;  %v4118_v33 = vld [vmem:[%s6022_s3 + $0x304] ss:$8 sps:$4 sm:$0xff]  }
 0x360   : > { %3285 = vmatpush1.bf16.msra.mxu0 %v4029_v50  ;;  %3114 = vmatprep.subr.bf16.mxu1 %v4034_v25  ;;  %v4121_v50 = vld [vmem:[%s6022_s3 + $0x704] ss:$8 sps:$4 sm:$0xff]   ;;  %v4116_v25 = vld [vmem:[%s6022_s3 + $0x300] ss:$8 sps:$4 sm:$0xff]  }
 0x361   : > { %3286 = vmatprep.subr.bf16.mxu0 %v4037_v28  ;;  %v4119_v28 = vld [vmem:[%s6022_s3 + $0x700] ss:$8 sps:$4 sm:$0xff]  }
 0x363   : > { %3115 = vmatpush1.bf16.msra.mxu1 %v4032_v11  ;;  %v4124_v11 = vld [vmem:[%s6022_s3 + $0x314] ss:$8 sps:$4 sm:$0xff]  }
 0x364   : > { %3287 = vmatpush1.bf16.msra.mxu0 %v4035_v0  ;;  %3116 = vmatprep.subr.bf16.mxu1 %v4040_v16  ;;  %v4127_v0 = vld [vmem:[%s6022_s3 + $0x714] ss:$8 sps:$4 sm:$0xff]   ;;  %v4122_v16 = vld [vmem:[%s6022_s3 + $0x310] ss:$8 sps:$4 sm:$0xff]  }
 0x365   : > { %3288 = vmatprep.subr.bf16.mxu0 %v4043_v47  ;;  %v4125_v47 = vld [vmem:[%s6022_s3 + $0x710] ss:$8 sps:$4 sm:$0xff]  }
 0x367   : > { %3117 = vmatpush1.bf16.msra.mxu1 %v4038_v55  ;;  %v4131_v55 = vld [vmem:[%s6022_s3 + $0x720] ss:$8 sps:$4 sm:$0xff]  }
 0x368   : > { %3289 = vmatpush1.bf16.msra.mxu0 %v4041_v35  ;;  %3118 = vmatprep.subr.bf16.mxu1 %v4046_v6  ;;  %v4139_v35 = vld [vmem:[%s6022_s3 + $0x734] ss:$8 sps:$4 sm:$0xff]   ;;  %v4134_v6 = vld [vmem:[%s6022_s3 + $0x330] ss:$8 sps:$4 sm:$0xff]  }
 0x369   : > { %3290 = vmatprep.subr.bf16.mxu0 %v4049_v27  ;;  %v4137_v27 = vld [vmem:[%s6022_s3 + $0x730] ss:$8 sps:$4 sm:$0xff]  }
 0x36b   : > { %3119 = vmatpush1.bf16.msra.mxu1 %v4044_v18  ;;  %v4142_v18 = vld [vmem:[%s6022_s3 + $0x344] ss:$8 sps:$4 sm:$0xff]  }
 0x36c   : > { %3291 = vmatpush1.bf16.msra.mxu0 %v4047_v19  ;;  %3120 = vmatprep.subr.bf16.mxu1 %v4052_v36  ;;  %v4145_v19 = vld [vmem:[%s6022_s3 + $0x744] ss:$8 sps:$4 sm:$0xff]   ;;  %v4140_v36 = vld [vmem:[%s6022_s3 + $0x340] ss:$8 sps:$4 sm:$0xff]  }
 0x36d   : > { %3292 = vmatprep.subr.bf16.mxu0 %v4055_v3  ;;  %v4143_v3 = vld [vmem:[%s6022_s3 + $0x740] ss:$8 sps:$4 sm:$0xff]  }
 0x36f   : > { %3121 = vmatpush1.bf16.msra.mxu1 %v4050_v52  ;;  %v4148_v52 = vld [vmem:[%s6022_s3 + $0x354] ss:$8 sps:$4 sm:$0xff]  }
 0x370   : > { %3293 = vmatpush1.bf16.msra.mxu0 %v4053_v14  ;;  %3122 = vmatprep.subr.bf16.mxu1 %v4058_v5  ;;  %v4151_v14 = vld [vmem:[%s6022_s3 + $0x754] ss:$8 sps:$4 sm:$0xff]   ;;  %v4146_v5 = vld [vmem:[%s6022_s3 + $0x350] ss:$8 sps:$4 sm:$0xff]  }
 0x371   : > { %3294 = vmatprep.subr.bf16.mxu0 %v4061_v17  ;;  %v4149_v17 = vld [vmem:[%s6022_s3 + $0x750] ss:$8 sps:$4 sm:$0xff]  }
 0x373   : > { %3123 = vmatpush1.bf16.msra.mxu1 %v4056_v60  ;;  %v4154_v60 = vld [vmem:[%s6022_s3 + $0x364] ss:$8 sps:$4 sm:$0xff]  }
 0x374   : > { %3295 = vmatpush1.bf16.msra.mxu0 %v4059_v48  ;;  %3124 = vmatprep.subr.bf16.mxu1 %v4064_v44  ;;  %v4157_v48 = vld [vmem:[%s6022_s3 + $0x764] ss:$8 sps:$4 sm:$0xff]   ;;  %v4152_v44 = vld [vmem:[%s6022_s3 + $0x360] ss:$8 sps:$4 sm:$0xff]  }
 0x375   : > { %3296 = vmatprep.subr.bf16.mxu0 %v4067_v58  ;;  %v4155_v58 = vld [vmem:[%s6022_s3 + $0x760] ss:$8 sps:$4 sm:$0xff]  }
 0x377   : > { %3125 = vmatpush1.bf16.msra.mxu1 %v4062_v23  ;;  %v4160_v23 = vld [vmem:[%s6022_s3 + $0x374] ss:$8 sps:$4 sm:$0xff]  }
 0x378   : > { %3297 = vmatpush1.bf16.msra.mxu0 %v4065_v42  ;;  %3126 = vmatprep.subr.bf16.mxu1 %v4070_v8  ;;  %v4163_v42 = vld [vmem:[%s6022_s3 + $0x774] ss:$8 sps:$4 sm:$0xff]   ;;  %v4158_v8 = vld [vmem:[%s6022_s3 + $0x370] ss:$8 sps:$4 sm:$0xff]  }
 0x379   : > { %3298 = vmatprep.subr.bf16.mxu0 %v4073_v49  ;;  %v4161_v49 = vld [vmem:[%s6022_s3 + $0x770] ss:$8 sps:$4 sm:$0xff]  }
 0x37b   : > { %3127 = vmatpush1.bf16.msra.mxu1 %v4068_v32  ;;  %v4166_v32 = vld [vmem:[%s6022_s3 + $0x384] ss:$8 sps:$4 sm:$0xff]  }
 0x37c   : > { %3299 = vmatpush1.bf16.msra.mxu0 %v4071_v1  ;;  %3128 = vmatprep.subr.bf16.mxu1 %v4076_v4  ;;  %v4169_v1 = vld [vmem:[%s6022_s3 + $0x784] ss:$8 sps:$4 sm:$0xff]   ;;  %v4164_v4 = vld [vmem:[%s6022_s3 + $0x380] ss:$8 sps:$4 sm:$0xff]  }
 0x37d   : > { %3300 = vmatprep.subr.bf16.mxu0 %v4079_v34  ;;  %v4167_v34 = vld [vmem:[%s6022_s3 + $0x780] ss:$8 sps:$4 sm:$0xff]  }
 0x37f   : > { %3129 = vmatpush1.bf16.msra.mxu1 %v4074_v24  ;;  %v4172_v24 = vld [vmem:[%s6022_s3 + $0x394] ss:$8 sps:$4 sm:$0xff]  }
 0x380   : > { %3301 = vmatpush1.bf16.msra.mxu0 %v4077_v15  ;;  %3130 = vmatprep.subr.bf16.mxu1 %v4082_v13  ;;  %v4175_v15 = vld [vmem:[%s6022_s3 + $0x794] ss:$8 sps:$4 sm:$0xff]   ;;  %v4170_v13 = vld [vmem:[%s6022_s3 + $0x390] ss:$8 sps:$4 sm:$0xff]  }
 0x381   : > { %3302 = vmatprep.subr.bf16.mxu0 %v4085_v21  ;;  %v4173_v21 = vld [vmem:[%s6022_s3 + $0x790] ss:$8 sps:$4 sm:$0xff]  }
 0x383   : > { %3131 = vmatpush1.bf16.msra.mxu1 %v4080_v46  ;;  %v4178_v46 = vld [vmem:[%s6022_s3 + $0x3a4] ss:$8 sps:$4 sm:$0xff]  }
 0x384   : > { %3303 = vmatpush1.bf16.msra.mxu0 %v4083_v51  ;;  %3132 = vmatprep.subr.bf16.mxu1 %v4088_v53  ;;  %v4181_v51 = vld [vmem:[%s6022_s3 + $0x7a4] ss:$8 sps:$4 sm:$0xff]   ;;  %v4176_v53 = vld [vmem:[%s6022_s3 + $0x3a0] ss:$8 sps:$4 sm:$0xff]  }
 0x385   : > { %3304 = vmatprep.subr.bf16.mxu0 %v4091_v63  ;;  %v4179_v63 = vld [vmem:[%s6022_s3 + $0x7a0] ss:$8 sps:$4 sm:$0xff]  }
 0x387   : > { %3133 = vmatpush1.bf16.msra.mxu1 %v4086_v10  ;;  %v4184_v10 = vld [vmem:[%s6022_s3 + $0x3b4] ss:$8 sps:$4 sm:$0xff]  }
 0x388   : > { %3305 = vmatpush1.bf16.msra.mxu0 %v4089_v39  ;;  %3134 = vmatprep.subr.bf16.mxu1 %v4094_v30  ;;  %v4187_v39 = vld [vmem:[%s6022_s3 + $0x7b4] ss:$8 sps:$4 sm:$0xff]   ;;  %v4182_v30 = vld [vmem:[%s6022_s3 + $0x3b0] ss:$8 sps:$4 sm:$0xff]  }
 0x389   : > { %3306 = vmatprep.subr.bf16.mxu0 %v4097_v59  ;;  %v4185_v59 = vld [vmem:[%s6022_s3 + $0x7b0] ss:$8 sps:$4 sm:$0xff]  }
 0x38b   : > { %3135 = vmatpush1.bf16.msra.mxu1 %v4092_v54  ;;  %v4190_v54 = vld [vmem:[%s6022_s3 + $0x3c4] ss:$8 sps:$4 sm:$0xff]  }
 0x38c   : > { %3307 = vmatpush1.bf16.msra.mxu0 %v4095_v29  ;;  %3136 = vmatprep.subr.bf16.mxu1 %v4100_v22  ;;  %v4193_v29 = vld [vmem:[%s6022_s3 + $0x7c4] ss:$8 sps:$4 sm:$0xff]   ;;  %v4188_v22 = vld [vmem:[%s6022_s3 + $0x3c0] ss:$8 sps:$4 sm:$0xff]  }
 0x38d   : > { %3308 = vmatprep.subr.bf16.mxu0 %v4103_v57  ;;  %v4191_v57 = vld [vmem:[%s6022_s3 + $0x7c0] ss:$8 sps:$4 sm:$0xff]  }
 0x38f   : > { %3137 = vmatpush1.bf16.msra.mxu1 %v4098_v43  ;;  %v4196_v43 = vld [vmem:[%s6022_s3 + $0x3d4] ss:$8 sps:$4 sm:$0xff]  }
 0x390   : > { %3309 = vmatpush1.bf16.msra.mxu0 %v4101_v38  ;;  %3138 = vmatprep.subr.bf16.mxu1 %v4106_v61  ;;  %v4199_v38 = vld [vmem:[%s6022_s3 + $0x7d4] ss:$8 sps:$4 sm:$0xff]   ;;  %v4194_v61 = vld [vmem:[%s6022_s3 + $0x3d0] ss:$8 sps:$4 sm:$0xff]  }
 0x391   : > { %3310 = vmatprep.subr.bf16.mxu0 %v4109_v9  ;;  %v4197_v9 = vld [vmem:[%s6022_s3 + $0x7d0] ss:$8 sps:$4 sm:$0xff]  }
 0x393   : > { %3139 = vmatpush1.bf16.msra.mxu1 %v4104_v12  ;;  %v4202_v12 = vld [vmem:[%s6022_s3 + $0x3e4] ss:$8 sps:$4 sm:$0xff]  }
 0x394   : > { %3311 = vmatpush1.bf16.msra.mxu0 %v4107_v2  ;;  %3140 = vmatprep.subr.bf16.mxu1 %v4112_v26  ;;  %v4205_v2 = vld [vmem:[%s6022_s3 + $0x7e4] ss:$8 sps:$4 sm:$0xff]   ;;  %v4200_v26 = vld [vmem:[%s6022_s3 + $0x3e0] ss:$8 sps:$4 sm:$0xff]  }
 0x395   : > { %3312 = vmatprep.subr.bf16.mxu0 %v4115_v7  ;;  %v4203_v7 = vld [vmem:[%s6022_s3 + $0x7e0] ss:$8 sps:$4 sm:$0xff]  }
 0x397   : > { %3141 = vmatpush1.bf16.msra.mxu1 %v4110_v45  ;;  %v4208_v45 = vld [vmem:[%s6022_s3 + $0x3f4] ss:$8 sps:$4 sm:$0xff]  }
 0x398   : > { %3313 = vmatpush1.bf16.msra.mxu0 %v4113_v56  ;;  %3153 = vmatprep.subr.bf16.mxu1 %v4118_v33  ;;  %v4211_v56 = vld [vmem:[%s6022_s3 + $0x7f4] ss:$8 sps:$4 sm:$0xff]   ;;  %v4206_v33 = vld [vmem:[%s6022_s3 + $0x3f0] ss:$8 sps:$4 sm:$0xff]  }
 0x399   : > { %3325 = vmatprep.subr.bf16.mxu0 %v4121_v50  ;;  %v4209_v50 = vld [vmem:[%s6022_s3 + $0x7f0] ss:$8 sps:$4 sm:$0xff]  }
 0x39a   : > { %3143 = vmatmul.mubr.bf16.vlgmr.msra.gmra.mrb[0].mxu1 %v5379_v37  ;;  %v4130_v37 = vld [vmem:[%s6022_s3 + $0x324] ss:$8 sps:$4 sm:$0xff]  }
 0x39b   : > { %3315 = vmatmul.mubr.bf16.vlgmr.msra.gmra.mrb[0].mxu0 %v5417_v41  ;;  %3154 = vmatpush1.bf16.msra.mxu1 %v4116_v25  ;;  %v4133_v41 = vld [vmem:[%s6022_s3 + $0x724] ss:$8 sps:$4 sm:$0xff]   ;;  %v1732_v25 = vld [vmem:[%s6023_s4] sm:$0x3] }
 0x39c   : > { %3185 = vmatprep.mubr.bf16.mxu1 %v5439_v20  ;;  %3326 = vmatpush1.bf16.msra.mxu0 %v4119_v28  ;;  %v4128_v20 = vld [vmem:[%s6022_s3 + $0x320] ss:$8 sps:$4 sm:$0xff]  }
 0x39d   : > { %3357 = vmatprep.mubr.bf16.mxu0 %v5444_v40  ;;  %3155 = vmatprep.subr.bf16.mxu1 %v4124_v11  ;;  %v4136_v40 = vld [vmem:[%s6022_s3 + $0x334] ss:$8 sps:$4 sm:$0xff]   ;;  %v6097_v28 = vld [vmem:[#allocation22_spill] sm:$0xff] }
 0x39e   : > { %3327 = vmatprep.subr.bf16.mxu0 %v4127_v0  ;;  %v1737_v11 = vrot.slane %v1732_v25, %v6097_v28  ;;  %v6098_v0 = vld [vmem:[#allocation21_spill] sm:$0xff] }
 0x39f   : > { %3156 = vmatpush1.bf16.msra.mxu1 %v4122_v16  ;;  %v1741_v16 = vrot.slane %v1732_v25, %v6098_v0 }
 0x3a0   : > { %3328 = vmatpush1.bf16.msra.mxu0 %v4125_v47  ;;  %3157 = vmatprep.subr.bf16.mxu1 %v4130_v37 }
 0x3a1   : > { %3329 = vmatprep.subr.bf16.mxu0 %v4133_v41 }
 0x3a3   : > { %3158 = vmatpush1.bf16.msra.mxu1 %v4128_v20 }
 0x3a4   : > { %3330 = vmatpush1.bf16.msra.mxu0 %v4131_v55  ;;  %3159 = vmatprep.subr.bf16.mxu1 %v4136_v40 }
 0x3a5   : > { %3331 = vmatprep.subr.bf16.mxu0 %v4139_v35 }
 0x3a7   : > { %3160 = vmatpush1.bf16.msra.mxu1 %v4134_v6 }
 0x3a8   : > { %3332 = vmatpush1.bf16.msra.mxu0 %v4137_v27  ;;  %3161 = vmatprep.subr.bf16.mxu1 %v4142_v18 }
 0x3a9   : > { %3333 = vmatprep.subr.bf16.mxu0 %v4145_v19 }
 0x3ab   : > { %3162 = vmatpush1.bf16.msra.mxu1 %v4140_v36 }
 0x3ac   : > { %3334 = vmatpush1.bf16.msra.mxu0 %v4143_v3  ;;  %3163 = vmatprep.subr.bf16.mxu1 %v4148_v52 }
 0x3ad   : > { %3335 = vmatprep.subr.bf16.mxu0 %v4151_v14 }
 0x3af   : > { %3164 = vmatpush1.bf16.msra.mxu1 %v4146_v5 }
 0x3b0   : > { %3336 = vmatpush1.bf16.msra.mxu0 %v4149_v17  ;;  %3165 = vmatprep.subr.bf16.mxu1 %v4154_v60 }
 0x3b1   : > { %3337 = vmatprep.subr.bf16.mxu0 %v4157_v48 }
 0x3b3   : > { %3166 = vmatpush1.bf16.msra.mxu1 %v4152_v44 }
 0x3b4   : > { %3338 = vmatpush1.bf16.msra.mxu0 %v4155_v58  ;;  %3167 = vmatprep.subr.bf16.mxu1 %v4160_v23 }
 0x3b5   : > { %3339 = vmatprep.subr.bf16.mxu0 %v4163_v42 }
 0x3b7   : > { %3168 = vmatpush1.bf16.msra.mxu1 %v4158_v8 }
 0x3b8   : > { %3340 = vmatpush1.bf16.msra.mxu0 %v4161_v49  ;;  %3169 = vmatprep.subr.bf16.mxu1 %v4166_v32 }
 0x3b9   : > { %3341 = vmatprep.subr.bf16.mxu0 %v4169_v1 }
 0x3bb   : > { %3170 = vmatpush1.bf16.msra.mxu1 %v4164_v4 }
 0x3bc   : > { %3342 = vmatpush1.bf16.msra.mxu0 %v4167_v34  ;;  %3171 = vmatprep.subr.bf16.mxu1 %v4172_v24 }
 0x3bd   : > { %3343 = vmatprep.subr.bf16.mxu0 %v4175_v15 }
 0x3bf   : > { %3172 = vmatpush1.bf16.msra.mxu1 %v4170_v13 }
 0x3c0   : > { %3344 = vmatpush1.bf16.msra.mxu0 %v4173_v21  ;;  %3173 = vmatprep.subr.bf16.mxu1 %v4178_v46 }
 0x3c1   : > { %3345 = vmatprep.subr.bf16.mxu0 %v4181_v51 }
 0x3c3   : > { %3174 = vmatpush1.bf16.msra.mxu1 %v4176_v53 }
 0x3c4   : > { %3346 = vmatpush1.bf16.msra.mxu0 %v4179_v63  ;;  %3175 = vmatprep.subr.bf16.mxu1 %v4184_v10 }
 0x3c5   : > { %3347 = vmatprep.subr.bf16.mxu0 %v4187_v39 }
 0x3c7   : > { %3176 = vmatpush1.bf16.msra.mxu1 %v4182_v30 }
 0x3c8   : > { %3348 = vmatpush1.bf16.msra.mxu0 %v4185_v59  ;;  %3177 = vmatprep.subr.bf16.mxu1 %v4190_v54 }
 0x3c9   : > { %3349 = vmatprep.subr.bf16.mxu0 %v4193_v29 }
 0x3cb   : > { %3178 = vmatpush1.bf16.msra.mxu1 %v4188_v22 }
 0x3cc   : > { %3350 = vmatpush1.bf16.msra.mxu0 %v4191_v57  ;;  %3179 = vmatprep.subr.bf16.mxu1 %v4196_v43 }
 0x3cd   : > { %3351 = vmatprep.subr.bf16.mxu0 %v4199_v38 }
 0x3cf   : > { %3180 = vmatpush1.bf16.msra.mxu1 %v4194_v61 }
 0x3d0   : > { %3352 = vmatpush1.bf16.msra.mxu0 %v4197_v9  ;;  %3181 = vmatprep.subr.bf16.mxu1 %v4202_v12 }
 0x3d1   : > { %3353 = vmatprep.subr.bf16.mxu0 %v4205_v2 }
 0x3d3   : > { %3182 = vmatpush1.bf16.msra.mxu1 %v4200_v26 }
 0x3d4   : > { %3354 = vmatpush1.bf16.msra.mxu0 %v4203_v7  ;;  %3183 = vmatprep.subr.bf16.mxu1 %v4208_v45 }
 0x3d5   : > { %3355 = vmatprep.subr.bf16.mxu0 %v4211_v56 }
 0x3d7   : > { %3184 = vmatpush1.bf16.msra.mxu1 %v4206_v33 }
 0x3d8   : > { %3356 = vmatpush1.bf16.msra.mxu0 %v4209_v50 }
 0x3da   : > { %3186 = vmatmul.mubr.bf16.vlgmr.msra.gmra.mrb[0].mxu1 %v5459_v62 }
 0x3db   : > { %3358 = vmatmul.mubr.bf16.vlgmr.msra.gmra.mrb[0].mxu0 %v5467_v31 }
 0x4ad   : > { %v3187_v47 = vpop.f32.mrb[0].mxu1 }
 0x4ae   : > { %v3739_v37 = vadd.f32 %v3187_v47, %v1737_v11  ;;  %v3359_v41 = vpop.f32.mrb[0].mxu0  ;;  %v3189_v20 = vpop.f32.mrb[1].mxu1 }
 0x4af   : > { %v3741_v62 = vadd.f32 %v3189_v20, %v1741_v16  ;;  %v3361_v55 = vpop.f32.mrb[1].mxu0  ;;  %v3191_v31 = vpop.f32.mrb[2].mxu1 }
 0x4b0   : > { %v3740_v40 = vadd.f32 %v3739_v37, %v3359_v41  ;;  %v3743_v35 = vadd.f32 %v3191_v31, %v1737_v11  ;;  %v3363_v6 = vpop.f32.mrb[2].mxu0  ;;  %v3193_v27 = vpop.f32.mrb[3].mxu1 }
 0x4b1   : > { %v3742_v18 = vadd.f32 %v3741_v62, %v3361_v55  ;;  %v3745_v19 = vadd.f32 %v3193_v27, %v1741_v16  ;;  %v3365_v36 = vpop.f32.mrb[3].mxu0 }
 0x4b2   : > { %3368 = vst [vmem:[%s239_s14] sm:$0xff] %v3740_v40  ;;  %v3744_v3 = vadd.f32 %v3743_v35, %v3363_v6 }
 0x4b3   : > { %3369 = vst [vmem:[%s239_s14 + $0x8] sm:$0xff] %v3742_v18  ;;  %v3746_v52 = vadd.f32 %v3745_v19, %v3365_v36 }
 0x4b4   : > { %3370 = vst [vmem:[%s239_s14 + $0x10] sm:$0xff] %v3744_v3 }
 0x4b5   : > { %3371 = vst [vmem:[%s239_s14 + $0x18] sm:$0xff] %v3746_v52 }
 0x4b6   : > { %4229 = shalt.err (!%p4226_p5)
}
 0x4b7   : > { %s4230_s8 = scalar_lea.hbm %s5971_s24, 512  ;;  %s4234_s12 = scalar_lea.hbm %s6024_s5, 1024 }
 0x4b8   : > { %p4231_p6 = scmp.ne.s32.totalorder %s5971_s24, %s4230_s8  ;;  %p4235_p10 = scmp.lt.u32.totalorder %s5971_s24, %s6024_s5 }
 0x4b9   : > { %p4236_p11 = scmp.lt.u32.totalorder %s4234_s12, %s4230_s8  ;;  %p4238_p13 = scmp.lt.u32.totalorder %s4230_s8, %s5971_s24 }
 0x4ba   : > { %p4232_p7 = pnand %p4231_p6, %p4369_p4 }
 0x4bb   : > { %p4237_p12 = por %p4236_p11, %p4235_p10 }
 0x4bc   : > { %p4233_p9 = pneg %p4232_p7 }
 0x4bd   : > { %p4239_p0 = por %p4238_p13, %p4237_p12 }
 0x4bf   : > { %p4240_p1 = pnand %p4239_p0, %p4233_p9 }
 0x4c1   : > { %4243 = shalt.err (!%p4240_p1)
}
 0x4c2   : > { %s4297_s16 = smov 256   ;;  %s4298_s17 = smov 16  }
 0x4c3   : > { %3771 = dma.vmem_to_hbm [thread:$0]  (%p4369_p4), %s5966_s15, 512, %s5971_s24, %s5973_s21, %s4297_s16, %s4297_s16, %s4298_s17  }
 0x4c4 PF: > { %p3777_p2 = scmp.ge.s32.totalorder %s4294_s23, 2  ;;  %s3404_s11 = sand.u32 1, %s4274_s18  }
 0x4c5   : > { %s3405_s25 = scalar_lea.sflag [#allocation3], %s3404_s11 }
 0x4c6   : > { %p3774_p3 = pnand %p3777_p2, %p4376_p8 }
 0x4c8   : > { %4269 = dma.done.wait (!%p3774_p3), %s3405_s25, 512  }
 0x4c9   : > { %4271 = vsyncadd (!%p3774_p3), %s3405_s25, 4294966784  ;;  %s18_s23 = sadd.s32 1, %s4294_s23   ;;  %s6099_s18 = smov %s4278_s19 }
 0x4ca   : > { %p15_p5 = scmp.ge.s32.totalorder %s18_s23, 4   ;;  %s6100_s19 = smov %s4282_s20 }
 0x4cb   : > { %s6101_s20 = smov %s4382_s6  ;;  %s6102_s21 = smov %s4290_s22 }
 0x4cc   : > { %s6103_s22 = smov %s6105_s26  ;;  %17 = sbr.rel (!%p15_p5) target bundleno = 4 (0x4), region = 75 }
 0x4d3   :  { %3410 = vsyncpa [#allocation3], 1 }
 0x4d4   :  { %3412 = vsyncpa [#allocation3 + $0x1], 1 }

</bundles_post_ra>
